<compile_context>
chip_gen: v5e
topology: v5e:2x2
jax: 0.10.0
libtpu: 0.0.40
codegen_flags: <defaults>
</compile_context>

<pallas_src>
import functools

import jax
import jax.numpy as jnp
from jax.experimental import pallas as pl
from jax.experimental.pallas import tpu as pltpu


def _choose_tile(total, preferred, align):
    """Largest tile <= preferred that divides `total` and is a multiple of
    `align`; falls back to the full extent (always a legal block dim)."""
    if total <= preferred or total % align != 0:
        return total
    t = (min(preferred, total) // align) * align
    while t >= align:
        if total % t == 0:
            return t
        t -= align
    return total


def _vmem_limit_bytes():
    """Per-generation VMEM budget: capacity minus headroom, capped at 100 MiB
    (so v5e/v6e get ~100 MiB, v7x gets ~48 MiB instead of all 64)."""
    try:
        cap = int(pltpu.get_tpu_info().vmem_capacity_bytes)
        return max(32 * 1024 * 1024, min(cap - 16 * 1024 * 1024, 100 * 1024 * 1024))
    except Exception:
        return 64 * 1024 * 1024


def _make_kernel(ff_chunk):
    def kernel(x_res_ref, adj_ref, xk_ref,
               wg_ref, bg_ref, g1_ref, be1_ref,
               w1_ref, b1_ref, w2_ref, b2_ref,
               g2_ref, be2_ref,
               o_ref, acc_ref):
        k = pl.program_id(1)

        @pl.when(k == 0)
        def _init():
            acc_ref[...] = jnp.zeros_like(acc_ref)

        # A_hat tile (bf16) @ X tile (bf16) -> resident f32 accumulator.
        acc_ref[...] += jnp.dot(adj_ref[...], xk_ref[...],
                                preferred_element_type=jnp.float32)

        @pl.when(k == pl.num_programs(1) - 1)
        def _epilogue():
            eps = 1e-5
            # GCNConv linear, reassociated: (A_hat @ X) @ Wg + bg.
            gcn = jnp.dot(acc_ref[...].astype(jnp.bfloat16), wg_ref[...],
                          preferred_element_type=jnp.float32) + bg_ref[...]
            h = gcn + x_res_ref[...].astype(jnp.float32)            # dropout1 = id

            # --- LayerNorm 1 (f32 VPU/EUP math) -----------------------------
            mu = jnp.mean(h, axis=-1, keepdims=True)
            var = jnp.mean((h - mu) * (h - mu), axis=-1, keepdims=True)
            h = (h - mu) * jax.lax.rsqrt(var + eps)
            h = h * g1_ref[...] + be1_ref[...]

            residual2 = h

            # --- FFN: Linear -> SiLU -> (Dropout=id) -> Linear --------------
            # FF dimension chunked so the live f32 intermediate is (tm, ff_chunk)
            # instead of (tm, FF)  (bounds vreg/VMEM pressure in the epilogue).
            hb = h.astype(jnp.bfloat16)
            ff_total = w1_ref.shape[1]
            f = jnp.zeros_like(h)
            for c0 in range(0, ff_total, ff_chunk):
                c1 = min(c0 + ff_chunk, ff_total)
                t = jnp.dot(hb, w1_ref[:, c0:c1],
                            preferred_element_type=jnp.float32) + b1_ref[:, c0:c1]
                t = t * jax.nn.sigmoid(t)                           # SiLU (f32)
                f = f + jnp.dot(t.astype(jnp.bfloat16), w2_ref[c0:c1, :],
                                preferred_element_type=jnp.float32)
            h = f + b2_ref[...] + residual2                         # dropout2 = id

            # --- LayerNorm 2 -------------------------------------------------
            mu = jnp.mean(h, axis=-1, keepdims=True)
            var = jnp.mean((h - mu) * (h - mu), axis=-1, keepdims=True)
            h = (h - mu) * jax.lax.rsqrt(var + eps)
            h = h * g2_ref[...] + be2_ref[...]

            o_ref[...] = h.astype(o_ref.dtype)

    return kernel


@functools.partial(jax.jit, static_argnames=("single_buffer_consts",))
def graph_conv_encoder_layer(x, edge_index, params, single_buffer_consts=True):
    """x: (B, N, H) float32.  edge_index: (2, E) int32 over flattened B*N nodes."""
    B, N, H = x.shape
    BN = B * N
    FF = params["w1"].shape[1]
    x_flat = x.reshape(BN, H)
    x_bf16 = x_flat.astype(jnp.bfloat16)      # bf16 K-operand stream for the MXU

    # --- glue: symmetrically-normalized adjacency with self loops -----------
    # (PyG GCNConv default: add_self_loops=True, normalize=True, edge_weight=1)
    # O(E) degree pass + ONE bf16 scatter; no dense f32 BN^2 intermediates.
    src = edge_index[0]
    dst = edge_index[1]
    loop = jnp.arange(BN, dtype=edge_index.dtype)
    src = jnp.concatenate([src, loop])
    dst = jnp.concatenate([dst, loop])
    deg = jnp.zeros((BN,), jnp.float32).at[dst].add(1.0)        # in-deg incl. loop
    dinv = jnp.where(deg > 0.0, jax.lax.rsqrt(deg), 0.0)
    vals = (dinv[dst] * dinv[src]).astype(jnp.bfloat16)
    adj = jnp.zeros((BN, BN), jnp.bfloat16).at[dst, src].add(vals)
    # TODO(synk): exploit adjacency sparsity (scalar-prefetched occupancy table or
    # per-graph block-diagonal bands) so all-zero (tm, tk) tiles are never DMA'd.

    wg = params["wg"].astype(jnp.bfloat16)
    w1 = params["w1"].astype(jnp.bfloat16)
    w2 = params["w2"].astype(jnp.bfloat16)

    # --- tiling --------------------------------------------------------------
    tm = _choose_tile(BN, 512, 16)      # row tile, 16-aligned (bf16 adj sublanes)
    if BN // tm < 2:                    # v7x megacore: keep >= 2 row tiles
        half = tm // 2
        if half >= 16 and half % 16 == 0 and BN % half == 0:
            tm = half
    tk = _choose_tile(BN, 2048, 128)    # reduction tile (lane dim of adj)
    grid = (BN // tm, BN // tk)

    ff_chunk = FF if FF <= 1024 else 1024

    def const_spec(shape):
        # Constant-index operands stay VMEM resident; single-buffer when possible.
        if single_buffer_consts:
            return pl.BlockSpec(shape, lambda i, k: (0, 0),
                                pipeline_mode=pl.Buffered(1))
        return pl.BlockSpec(shape, lambda i, k: (0, 0))

    out = pl.pallas_call(
        _make_kernel(ff_chunk),
        out_shape=jax.ShapeDtypeStruct((BN, H), x.dtype),
        grid_spec=pltpu.PrefetchScalarGridSpec(
            num_scalar_prefetch=0,
            grid=grid,
            in_specs=[
                pl.BlockSpec((tm, H), lambda i, k: (i, 0)),    # x residual (f32)
                pl.BlockSpec((tm, tk), lambda i, k: (i, k)),   # A_hat tile (bf16)
                pl.BlockSpec((tk, H), lambda i, k: (k, 0)),    # X tile (bf16)
                const_spec((H, H)),                            # wg
                const_spec((1, H)),                            # bg
                const_spec((1, H)),                            # gamma1
                const_spec((1, H)),                            # beta1
                const_spec((H, FF)),                           # w1
                const_spec((1, FF)),                           # b1
                const_spec((FF, H)),                           # w2
                const_spec((1, H)),                            # b2
                const_spec((1, H)),                            # gamma2
                const_spec((1, H)),                            # beta2
            ],
            out_specs=pl.BlockSpec((tm, H), lambda i, k: (i, 0)),
            scratch_shapes=[pltpu.VMEM((tm, H), jnp.float32)],
        ),
        compiler_params=pltpu.CompilerParams(
            dimension_semantics=("parallel", "arbitrary"),
            vmem_limit_bytes=_vmem_limit_bytes()),
    )(
        x_flat, adj, x_bf16,
        wg, params["bg"], params["gamma1"], params["beta1"],
        w1, params["b1"], w2, params["b2"],
        params["gamma2"], params["beta2"],
    )
    return out.reshape(B, N, H)


def init_params(key, hidden_dim, dim_feedforward_mult=4):
    ff = hidden_dim * dim_feedforward_mult
    ks = jax.random.split(key, 5)
    scale_g = 1.0 / jnp.sqrt(hidden_dim)
    scale_f = 1.0 / jnp.sqrt(ff)
    return {
        # GCNConv linear weight, stored (in, out) for right-multiplication
        "wg": jax.random.normal(ks[0], (hidden_dim, hidden_dim), jnp.float32) * scale_g,
        "bg": jnp.zeros((1, hidden_dim), jnp.float32),
        # feedforward
        "w1": jax.random.normal(ks[1], (hidden_dim, ff), jnp.float32) * scale_g,
        "b1": jax.random.normal(ks[2], (1, ff), jnp.float32) * 0.01,
        "w2": jax.random.normal(ks[3], (ff, hidden_dim), jnp.float32) * scale_f,
        "b2": jax.random.normal(ks[4], (1, hidden_dim), jnp.float32) * 0.01,
        # layer norms
        "gamma1": jnp.ones((1, hidden_dim), jnp.float32),
        "beta1": jnp.zeros((1, hidden_dim), jnp.float32),
        "gamma2": jnp.ones((1, hidden_dim), jnp.float32),
        "beta2": jnp.zeros((1, hidden_dim), jnp.float32),
    }


if __name__ == "__main__":
    key = jax.random.PRNGKey(0)
    k_x, k_e, k_p = jax.random.split(key, 3)

    # small shapes; hidden chosen lane-dense (multiple of 128) per perf review
    batch, num_nodes, hidden = 2, 8, 128
    BN = batch * num_nodes
    num_edges = 24

    x = jax.random.normal(k_x, (batch, num_nodes, hidden), jnp.float32)
    # random directed edges over the flattened (batch * num_nodes) node set
    edge_index = jax.random.randint(k_e, (2, num_edges), 0, BN, dtype=jnp.int32)

    params = init_params(k_p, hidden)

    try:
        out = graph_conv_encoder_layer(x, edge_index, params,
                                       single_buffer_consts=True)
        out = jax.block_until_ready(out)
    except Exception:
        # Portability fallback for jax versions without BlockSpec(pipeline_mode=...).
        out = graph_conv_encoder_layer(x, edge_index, params,
                                       single_buffer_consts=False)
        out = jax.block_until_ready(out)

    assert out.shape == (batch, num_nodes, hidden)
    print("KERNEL_OK")
</pallas_src>

<mosaic_0001>
module attributes {stable_mosaic.version = 11 : i64} {
  func.func @kernel(%arg0: i32, %arg1: i32, %arg2: memref<16x128xf32, #tpu.memory_space<vmem>>, %arg3: memref<16x16xbf16, #tpu.memory_space<vmem>>, %arg4: memref<16x128xbf16, #tpu.memory_space<vmem>>, %arg5: memref<128x128xbf16, #tpu.memory_space<vmem>>, %arg6: memref<1x128xf32, #tpu.memory_space<vmem>>, %arg7: memref<1x128xf32, #tpu.memory_space<vmem>>, %arg8: memref<1x128xf32, #tpu.memory_space<vmem>>, %arg9: memref<128x512xbf16, #tpu.memory_space<vmem>>, %arg10: memref<1x512xf32, #tpu.memory_space<vmem>>, %arg11: memref<512x128xbf16, #tpu.memory_space<vmem>>, %arg12: memref<1x128xf32, #tpu.memory_space<vmem>>, %arg13: memref<1x128xf32, #tpu.memory_space<vmem>>, %arg14: memref<1x128xf32, #tpu.memory_space<vmem>>, %arg15: memref<16x128xf32, #tpu.memory_space<vmem>>, %arg16: memref<16x128xf32, #tpu.memory_space<vmem>>) attributes {dimension_semantics = [#tpu.dimension_semantics<parallel>, #tpu.dimension_semantics<arbitrary>], iteration_bounds = array<i64: 1, 1>, scalar_prefetch = 0 : i64, scratch_operands = 1 : i64, tpu.core_type = #tpu.core_type<tc>, window_params = [{transform_indices = @transform_0, window_bounds = array<i64: 16, 128>}, {transform_indices = @transform_1, window_bounds = array<i64: 16, 16>}, {transform_indices = @transform_2, window_bounds = array<i64: 16, 128>}, {pipeline_mode = #tpu.pipeline_mode<synchronous>, transform_indices = @transform_3, window_bounds = array<i64: 128, 128>}, {pipeline_mode = #tpu.pipeline_mode<synchronous>, transform_indices = @transform_4, window_bounds = array<i64: 1, 128>}, {pipeline_mode = #tpu.pipeline_mode<synchronous>, transform_indices = @transform_5, window_bounds = array<i64: 1, 128>}, {pipeline_mode = #tpu.pipeline_mode<synchronous>, transform_indices = @transform_6, window_bounds = array<i64: 1, 128>}, {pipeline_mode = #tpu.pipeline_mode<synchronous>, transform_indices = @transform_7, window_bounds = array<i64: 128, 512>}, {pipeline_mode = #tpu.pipeline_mode<synchronous>, transform_indices = @transform_8, window_bounds = array<i64: 1, 512>}, {pipeline_mode = #tpu.pipeline_mode<synchronous>, transform_indices = @transform_9, window_bounds = array<i64: 512, 128>}, {pipeline_mode = #tpu.pipeline_mode<synchronous>, transform_indices = @transform_10, window_bounds = array<i64: 1, 128>}, {pipeline_mode = #tpu.pipeline_mode<synchronous>, transform_indices = @transform_11, window_bounds = array<i64: 1, 128>}, {pipeline_mode = #tpu.pipeline_mode<synchronous>, transform_indices = @transform_12, window_bounds = array<i64: 1, 128>}, {transform_indices = @transform_13, window_bounds = array<i64: 16, 128>}]} {
    %c0_i32 = arith.constant 0 : i32
    %0 = arith.cmpi eq, %arg1, %c0_i32 : i32
    %1 = arith.extui %0 : i1 to i32
    %c0_i32_0 = arith.constant 0 : i32
    %2 = arith.cmpi ne, %1, %c0_i32_0 : i32
    scf.if %2 {
      %cst_10 = arith.constant 0.000000e+00 : f32
      %12 = vector.broadcast %cst_10 : f32 to vector<16x128xf32>
      %c0_11 = arith.constant 0 : index
      %c0_12 = arith.constant 0 : index
      %13 = vector.load %arg16[%c0_11, %c0_12] : memref<16x128xf32, #tpu.memory_space<vmem>>, vector<16x128xf32>
      tpu.vector_store %arg16[%c0_11, %c0_12], %12 {strides = array<i32>} : memref<16x128xf32, #tpu.memory_space<vmem>>, vector<16x128xf32>,
    } else {
    }
    %c0 = arith.constant 0 : index
    %c0_1 = arith.constant 0 : index
    %3 = vector.load %arg16[%c0, %c0_1] : memref<16x128xf32, #tpu.memory_space<vmem>>, vector<16x128xf32>
    %c0_2 = arith.constant 0 : index
    %c0_3 = arith.constant 0 : index
    %4 = vector.load %arg3[%c0_2, %c0_3] : memref<16x16xbf16, #tpu.memory_space<vmem>>, vector<16x16xbf16>
    %c0_4 = arith.constant 0 : index
    %c0_5 = arith.constant 0 : index
    %5 = vector.load %arg4[%c0_4, %c0_5] : memref<16x128xbf16, #tpu.memory_space<vmem>>, vector<16x128xbf16>
    %cst = arith.constant dense<0.000000e+00> : vector<16x128xf32>
    %6 = tpu.matmul %4, %5, %cst {dimension_numbers = #tpu.dot_dimension_numbers<[1], [0], [0], [1], [0, 0, 1, 1], [], []>} : vector<16x16xbf16>, vector<16x128xbf16>, vector<16x128xf32> -> vector<16x128xf32>
    %7 = arith.addf %3, %6 : vector<16x128xf32>
    %c0_6 = arith.constant 0 : index
    %c0_7 = arith.constant 0 : index
    %8 = vector.load %arg16[%c0_6, %c0_7] : memref<16x128xf32, #tpu.memory_space<vmem>>, vector<16x128xf32>
    tpu.vector_store %arg16[%c0_6, %c0_7], %7 {strides = array<i32>} : memref<16x128xf32, #tpu.memory_space<vmem>>, vector<16x128xf32>,
    %c0_i32_8 = arith.constant 0 : i32
    %9 = arith.cmpi eq, %arg1, %c0_i32_8 : i32
    %10 = arith.extui %9 : i1 to i32
    %c0_i32_9 = arith.constant 0 : i32
    %11 = arith.cmpi ne, %10, %c0_i32_9 : i32
    scf.if %11 {
      %c0_10 = arith.constant 0 : index
      %c0_11 = arith.constant 0 : index
      %12 = vector.load %arg16[%c0_10, %c0_11] : memref<16x128xf32, #tpu.memory_space<vmem>>, vector<16x128xf32>
      %13 = arith.truncf %12 : vector<16x128xf32> to vector<16x128xbf16>
      %c0_12 = arith.constant 0 : index
      %c0_13 = arith.constant 0 : index
      %14 = vector.load %arg5[%c0_12, %c0_13] : memref<128x128xbf16, #tpu.memory_space<vmem>>, vector<128x128xbf16>
      %cst_14 = arith.constant dense<0.000000e+00> : vector<16x128xf32>
      %15 = tpu.matmul %13, %14, %cst_14 {dimension_numbers = #tpu.dot_dimension_numbers<[1], [0], [0], [1], [0, 0, 1, 1], [], []>} : vector<16x128xbf16>, vector<128x128xbf16>, vector<16x128xf32> -> vector<16x128xf32>
      %c0_15 = arith.constant 0 : index
      %c0_16 = arith.constant 0 : index
      %16 = vector.load %arg6[%c0_15, %c0_16] : memref<1x128xf32, #tpu.memory_space<vmem>>, vector<1x128xf32>
      %17 = vector.broadcast %16 : vector<1x128xf32> to vector<16x128xf32>
      %18 = arith.addf %15, %17 : vector<16x128xf32>
      %c0_17 = arith.constant 0 : index
      %c0_18 = arith.constant 0 : index
      %19 = vector.load %arg2[%c0_17, %c0_18] : memref<16x128xf32, #tpu.memory_space<vmem>>, vector<16x128xf32>
      %20 = arith.addf %18, %19 : vector<16x128xf32>
      %cst_19 = arith.constant dense<0.000000e+00> : vector<16xf32>
      %21 = vector.multi_reduction <add>, %20, %cst_19 [1] : vector<16x128xf32> to vector<16xf32>
      %22 = vector.shape_cast %21 : vector<16xf32> to vector<16x1xf32>
      %cst_20 = arith.constant 1.280000e+02 : f32
      %23 = vector.broadcast %cst_20 : f32 to vector<16x1xf32>
      %24 = arith.divf %22, %23 : vector<16x1xf32>
      %25 = vector.broadcast %24 : vector<16x1xf32> to vector<16x128xf32>
      %26 = arith.subf %20, %25 : vector<16x128xf32>
      %27 = vector.broadcast %24 : vector<16x1xf32> to vector<16x128xf32>
      %28 = arith.subf %20, %27 : vector<16x128xf32>
      %29 = arith.mulf %26, %28 : vector<16x128xf32>
      %cst_21 = arith.constant dense<0.000000e+00> : vector<16xf32>
      %30 = vector.multi_reduction <add>, %29, %cst_21 [1] : vector<16x128xf32> to vector<16xf32>
      %31 = vector.shape_cast %30 : vector<16xf32> to vector<16x1xf32>
      %cst_22 = arith.constant 1.280000e+02 : f32
      %32 = vector.broadcast %cst_22 : f32 to vector<16x1xf32>
      %33 = arith.divf %31, %32 : vector<16x1xf32>
      %34 = vector.broadcast %24 : vector<16x1xf32> to vector<16x128xf32>
      %35 = arith.subf %20, %34 : vector<16x128xf32>
      %cst_23 = arith.constant 9.99999974E-6 : f32
      %36 = vector.broadcast %cst_23 : f32 to vector<16x1xf32>
      %37 = arith.addf %33, %36 : vector<16x1xf32>
      %38 = math.rsqrt %37 : vector<16x1xf32>
      %39 = vector.broadcast %38 : vector<16x1xf32> to vector<16x128xf32>
      %40 = arith.mulf %35, %39 : vector<16x128xf32>
      %c0_24 = arith.constant 0 : index
      %c0_25 = arith.constant 0 : index
      %41 = vector.load %arg7[%c0_24, %c0_25] : memref<1x128xf32, #tpu.memory_space<vmem>>, vector<1x128xf32>
      %42 = vector.broadcast %41 : vector<1x128xf32> to vector<16x128xf32>
      %43 = arith.mulf %40, %42 : vector<16x128xf32>
      %c0_26 = arith.constant 0 : index
      %c0_27 = arith.constant 0 : index
      %44 = vector.load %arg8[%c0_26, %c0_27] : memref<1x128xf32, #tpu.memory_space<vmem>>, vector<1x128xf32>
      %45 = vector.broadcast %44 : vector<1x128xf32> to vector<16x128xf32>
      %46 = arith.addf %43, %45 : vector<16x128xf32>
      %47 = arith.truncf %46 : vector<16x128xf32> to vector<16x128xbf16>
      %cst_28 = arith.constant 0.000000e+00 : f32
      %48 = vector.broadcast %cst_28 : f32 to vector<16x128xf32>
      %c0_29 = arith.constant 0 : index
      %c0_30 = arith.constant 0 : index
      %49 = vector.load %arg9[%c0_29, %c0_30] : memref<128x512xbf16, #tpu.memory_space<vmem>>, vector<128x512xbf16>
      %cst_31 = arith.constant dense<0.000000e+00> : vector<16x512xf32>
      %50 = tpu.matmul %47, %49, %cst_31 {dimension_numbers = #tpu.dot_dimension_numbers<[1], [0], [0], [1], [0, 0, 1, 1], [], []>} : vector<16x128xbf16>, vector<128x512xbf16>, vector<16x512xf32> -> vector<16x512xf32>
      %c0_32 = arith.constant 0 : index
      %c0_33 = arith.constant 0 : index
      %51 = vector.load %arg10[%c0_32, %c0_33] : memref<1x512xf32, #tpu.memory_space<vmem>>, vector<1x512xf32>
      %52 = vector.broadcast %51 : vector<1x512xf32> to vector<16x512xf32>
      %53 = arith.addf %50, %52 : vector<16x512xf32>
      %54 = arith.negf %53 : vector<16x512xf32>
      %55 = math.exp %54 : vector<16x512xf32>
      %cst_34 = arith.constant 1.000000e+00 : f32
      %56 = vector.broadcast %cst_34 : f32 to vector<16x512xf32>
      %57 = arith.addf %56, %55 : vector<16x512xf32>
      %58 = arith.divf %56, %57 : vector<16x512xf32>
      %59 = arith.mulf %53, %58 : vector<16x512xf32>
      %60 = arith.truncf %59 : vector<16x512xf32> to vector<16x512xbf16>
      %c0_35 = arith.constant 0 : index
      %c0_36 = arith.constant 0 : index
      %61 = vector.load %arg11[%c0_35, %c0_36] : memref<512x128xbf16, #tpu.memory_space<vmem>>, vector<512x128xbf16>
      %cst_37 = arith.constant dense<0.000000e+00> : vector<16x128xf32>
      %62 = tpu.matmul %60, %61, %cst_37 {dimension_numbers = #tpu.dot_dimension_numbers<[1], [0], [0], [1], [0, 0, 1, 1], [], []>} : vector<16x512xbf16>, vector<512x128xbf16>, vector<16x128xf32> -> vector<16x128xf32>
      %63 = arith.addf %48, %62 : vector<16x128xf32>
      %c0_38 = arith.constant 0 : index
      %c0_39 = arith.constant 0 : index
      %64 = vector.load %arg12[%c0_38, %c0_39] : memref<1x128xf32, #tpu.memory_space<vmem>>, vector<1x128xf32>
      %65 = vector.broadcast %64 : vector<1x128xf32> to vector<16x128xf32>
      %66 = arith.addf %63, %65 : vector<16x128xf32>
      %67 = arith.addf %66, %46 : vector<16x128xf32>
      %cst_40 = arith.constant dense<0.000000e+00> : vector<16xf32>
      %68 = vector.multi_reduction <add>, %67, %cst_40 [1] : vector<16x128xf32> to vector<16xf32>
      %69 = vector.shape_cast %68 : vector<16xf32> to vector<16x1xf32>
      %cst_41 = arith.constant 1.280000e+02 : f32
      %70 = vector.broadcast %cst_41 : f32 to vector<16x1xf32>
      %71 = arith.divf %69, %70 : vector<16x1xf32>
      %72 = vector.broadcast %71 : vector<16x1xf32> to vector<16x128xf32>
      %73 = arith.subf %67, %72 : vector<16x128xf32>
      %74 = vector.broadcast %71 : vector<16x1xf32> to vector<16x128xf32>
      %75 = arith.subf %67, %74 : vector<16x128xf32>
      %76 = arith.mulf %73, %75 : vector<16x128xf32>
      %cst_42 = arith.constant dense<0.000000e+00> : vector<16xf32>
      %77 = vector.multi_reduction <add>, %76, %cst_42 [1] : vector<16x128xf32> to vector<16xf32>
      %78 = vector.shape_cast %77 : vector<16xf32> to vector<16x1xf32>
      %cst_43 = arith.constant 1.280000e+02 : f32
      %79 = vector.broadcast %cst_43 : f32 to vector<16x1xf32>
      %80 = arith.divf %78, %79 : vector<16x1xf32>
      %81 = vector.broadcast %71 : vector<16x1xf32> to vector<16x128xf32>
      %82 = arith.subf %67, %81 : vector<16x128xf32>
      %cst_44 = arith.constant 9.99999974E-6 : f32
      %83 = vector.broadcast %cst_44 : f32 to vector<16x1xf32>
      %84 = arith.addf %80, %83 : vector<16x1xf32>
      %85 = math.rsqrt %84 : vector<16x1xf32>
      %86 = vector.broadcast %85 : vector<16x1xf32> to vector<16x128xf32>
      %87 = arith.mulf %82, %86 : vector<16x128xf32>
      %c0_45 = arith.constant 0 : index
      %c0_46 = arith.constant 0 : index
      %88 = vector.load %arg13[%c0_45, %c0_46] : memref<1x128xf32, #tpu.memory_space<vmem>>, vector<1x128xf32>
      %89 = vector.broadcast %88 : vector<1x128xf32> to vector<16x128xf32>
      %90 = arith.mulf %87, %89 : vector<16x128xf32>
      %c0_47 = arith.constant 0 : index
      %c0_48 = arith.constant 0 : index
      %91 = vector.load %arg14[%c0_47, %c0_48] : memref<1x128xf32, #tpu.memory_space<vmem>>, vector<1x128xf32>
      %92 = vector.broadcast %91 : vector<1x128xf32> to vector<16x128xf32>
      %93 = arith.addf %90, %92 : vector<16x128xf32>
      %c0_49 = arith.constant 0 : index
      %c0_50 = arith.constant 0 : index
      %94 = vector.load %arg15[%c0_49, %c0_50] : memref<16x128xf32, #tpu.memory_space<vmem>>, vector<16x128xf32>
      tpu.vector_store %arg15[%c0_49, %c0_50], %93 {strides = array<i32>} : memref<16x128xf32, #tpu.memory_space<vmem>>, vector<16x128xf32>,
    } else {
    }
    return
  }
  func.func @transform_0(%arg0: i32, %arg1: i32) -> (i32, i32) {
    %c0_i32 = arith.constant 0 : i32
    %c0_i32_0 = arith.constant 0 : i32
    return %arg0, %c0_i32 : i32, i32
  }
  func.func @transform_1(%arg0: i32, %arg1: i32) -> (i32, i32) {
    %c0_i32 = arith.constant 0 : i32
    return %arg0, %arg1 : i32, i32
  }
  func.func @transform_2(%arg0: i32, %arg1: i32) -> (i32, i32) {
    %c0_i32 = arith.constant 0 : i32
    %c0_i32_0 = arith.constant 0 : i32
    return %arg1, %c0_i32 : i32, i32
  }
  func.func @transform_3(%arg0: i32, %arg1: i32) -> (i32, i32) {
    %c0_i32 = arith.constant 0 : i32
    %c0_i32_0 = arith.constant 0 : i32
    %c0_i32_1 = arith.constant 0 : i32
    return %c0_i32, %c0_i32_0 : i32, i32
  }
  func.func @transform_4(%arg0: i32, %arg1: i32) -> (i32, i32) {
    %c0_i32 = arith.constant 0 : i32
    %c0_i32_0 = arith.constant 0 : i32
    %c0_i32_1 = arith.constant 0 : i32
    return %c0_i32, %c0_i32_0 : i32, i32
  }
  func.func @transform_5(%arg0: i32, %arg1: i32) -> (i32, i32) {
    %c0_i32 = arith.constant 0 : i32
    %c0_i32_0 = arith.constant 0 : i32
    %c0_i32_1 = arith.constant 0 : i32
    return %c0_i32, %c0_i32_0 : i32, i32
  }
  func.func @transform_6(%arg0: i32, %arg1: i32) -> (i32, i32) {
    %c0_i32 = arith.constant 0 : i32
    %c0_i32_0 = arith.constant 0 : i32
    %c0_i32_1 = arith.constant 0 : i32
    return %c0_i32, %c0_i32_0 : i32, i32
  }
  func.func @transform_7(%arg0: i32, %arg1: i32) -> (i32, i32) {
    %c0_i32 = arith.constant 0 : i32
    %c0_i32_0 = arith.constant 0 : i32
    %c0_i32_1 = arith.constant 0 : i32
    return %c0_i32, %c0_i32_0 : i32, i32
  }
  func.func @transform_8(%arg0: i32, %arg1: i32) -> (i32, i32) {
    %c0_i32 = arith.constant 0 : i32
    %c0_i32_0 = arith.constant 0 : i32
    %c0_i32_1 = arith.constant 0 : i32
    return %c0_i32, %c0_i32_0 : i32, i32
  }
  func.func @transform_9(%arg0: i32, %arg1: i32) -> (i32, i32) {
    %c0_i32 = arith.constant 0 : i32
    %c0_i32_0 = arith.constant 0 : i32
    %c0_i32_1 = arith.constant 0 : i32
    return %c0_i32, %c0_i32_0 : i32, i32
  }
  func.func @transform_10(%arg0: i32, %arg1: i32) -> (i32, i32) {
    %c0_i32 = arith.constant 0 : i32
    %c0_i32_0 = arith.constant 0 : i32
    %c0_i32_1 = arith.constant 0 : i32
    return %c0_i32, %c0_i32_0 : i32, i32
  }
  func.func @transform_11(%arg0: i32, %arg1: i32) -> (i32, i32) {
    %c0_i32 = arith.constant 0 : i32
    %c0_i32_0 = arith.constant 0 : i32
    %c0_i32_1 = arith.constant 0 : i32
    return %c0_i32, %c0_i32_0 : i32, i32
  }
  func.func @transform_12(%arg0: i32, %arg1: i32) -> (i32, i32) {
    %c0_i32 = arith.constant 0 : i32
    %c0_i32_0 = arith.constant 0 : i32
    %c0_i32_1 = arith.constant 0 : i32
    return %c0_i32, %c0_i32_0 : i32, i32
  }
  func.func @transform_13(%arg0: i32, %arg1: i32) -> (i32, i32) {
    %c0_i32 = arith.constant 0 : i32
    %c0_i32_0 = arith.constant 0 : i32
    return %arg0, %c0_i32 : i32, i32
  }
}

module attributes {stable_mosaic.version = 11 : i64} {
  func.func @kernel(%arg0: i32, %arg1: i32, %arg2: memref<16x128xf32, #tpu.memory_space<vmem>>, %arg3: memref<16x16xbf16, #tpu.memory_space<vmem>>, %arg4: memref<16x128xbf16, #tpu.memory_space<vmem>>, %arg5: memref<128x128xbf16, #tpu.memory_space<vmem>>, %arg6: memref<1x128xf32, #tpu.memory_space<vmem>>, %arg7: memref<1x128xf32, #tpu.memory_space<vmem>>, %arg8: memref<1x128xf32, #tpu.memory_space<vmem>>, %arg9: memref<128x512xbf16, #tpu.memory_space<vmem>>, %arg10: memref<1x512xf32, #tpu.memory_space<vmem>>, %arg11: memref<512x128xbf16, #tpu.memory_space<vmem>>, %arg12: memref<1x128xf32, #tpu.memory_space<vmem>>, %arg13: memref<1x128xf32, #tpu.memory_space<vmem>>, %arg14: memref<1x128xf32, #tpu.memory_space<vmem>>, %arg15: memref<16x128xf32, #tpu.memory_space<vmem>>, %arg16: memref<16x128xf32, #tpu.memory_space<vmem>>) attributes {dimension_semantics = [#tpu.dimension_semantics<parallel>, #tpu.dimension_semantics<arbitrary>], iteration_bounds = array<i64: 1, 1>, scalar_prefetch = 0 : i64, scratch_operands = 1 : i64, tpu.core_type = #tpu.core_type<tc>, window_params = [{transform_indices = @transform_0, window_bounds = array<i64: 16, 128>}, {transform_indices = @transform_1, window_bounds = array<i64: 16, 16>}, {transform_indices = @transform_2, window_bounds = array<i64: 16, 128>}, {pipeline_mode = #tpu.pipeline_mode<synchronous>, transform_indices = @transform_3, window_bounds = array<i64: 128, 128>}, {pipeline_mode = #tpu.pipeline_mode<synchronous>, transform_indices = @transform_4, window_bounds = array<i64: 1, 128>}, {pipeline_mode = #tpu.pipeline_mode<synchronous>, transform_indices = @transform_5, window_bounds = array<i64: 1, 128>}, {pipeline_mode = #tpu.pipeline_mode<synchronous>, transform_indices = @transform_6, window_bounds = array<i64: 1, 128>}, {pipeline_mode = #tpu.pipeline_mode<synchronous>, transform_indices = @transform_7, window_bounds = array<i64: 128, 512>}, {pipeline_mode = #tpu.pipeline_mode<synchronous>, transform_indices = @transform_8, window_bounds = array<i64: 1, 512>}, {pipeline_mode = #tpu.pipeline_mode<synchronous>, transform_indices = @transform_9, window_bounds = array<i64: 512, 128>}, {pipeline_mode = #tpu.pipeline_mode<synchronous>, transform_indices = @transform_10, window_bounds = array<i64: 1, 128>}, {pipeline_mode = #tpu.pipeline_mode<synchronous>, transform_indices = @transform_11, window_bounds = array<i64: 1, 128>}, {pipeline_mode = #tpu.pipeline_mode<synchronous>, transform_indices = @transform_12, window_bounds = array<i64: 1, 128>}, {transform_indices = @transform_13, window_bounds = array<i64: 16, 128>}]} {
    %c0_i32 = arith.constant 0 : i32
    %0 = arith.cmpi eq, %arg1, %c0_i32 : i32
    %1 = arith.extui %0 : i1 to i32
    %c0_i32_0 = arith.constant 0 : i32
    %2 = arith.cmpi ne, %1, %c0_i32_0 : i32
    scf.if %2 {
      %cst_10 = arith.constant 0.000000e+00 : f32
      %12 = vector.broadcast %cst_10 : f32 to vector<16x128xf32>
      %c0_11 = arith.constant 0 : index
      %c0_12 = arith.constant 0 : index
      %13 = vector.load %arg16[%c0_11, %c0_12] : memref<16x128xf32, #tpu.memory_space<vmem>>, vector<16x128xf32>
      tpu.vector_store %arg16[%c0_11, %c0_12], %12 {strides = array<i32>} : memref<16x128xf32, #tpu.memory_space<vmem>>, vector<16x128xf32>,
    } else {
    }
    %c0 = arith.constant 0 : index
    %c0_1 = arith.constant 0 : index
    %3 = vector.load %arg16[%c0, %c0_1] : memref<16x128xf32, #tpu.memory_space<vmem>>, vector<16x128xf32>
    %c0_2 = arith.constant 0 : index
    %c0_3 = arith.constant 0 : index
    %4 = vector.load %arg3[%c0_2, %c0_3] : memref<16x16xbf16, #tpu.memory_space<vmem>>, vector<16x16xbf16>
    %c0_4 = arith.constant 0 : index
    %c0_5 = arith.constant 0 : index
    %5 = vector.load %arg4[%c0_4, %c0_5] : memref<16x128xbf16, #tpu.memory_space<vmem>>, vector<16x128xbf16>
    %cst = arith.constant dense<0.000000e+00> : vector<16x128xf32>
    %6 = tpu.matmul %4, %5, %cst {dimension_numbers = #tpu.dot_dimension_numbers<[1], [0], [0], [1], [0, 0, 1, 1], [], []>} : vector<16x16xbf16>, vector<16x128xbf16>, vector<16x128xf32> -> vector<16x128xf32>
    %7 = arith.addf %3, %6 : vector<16x128xf32>
    %c0_6 = arith.constant 0 : index
    %c0_7 = arith.constant 0 : index
    %8 = vector.load %arg16[%c0_6, %c0_7] : memref<16x128xf32, #tpu.memory_space<vmem>>, vector<16x128xf32>
    tpu.vector_store %arg16[%c0_6, %c0_7], %7 {strides = array<i32>} : memref<16x128xf32, #tpu.memory_space<vmem>>, vector<16x128xf32>,
    %c0_i32_8 = arith.constant 0 : i32
    %9 = arith.cmpi eq, %arg1, %c0_i32_8 : i32
    %10 = arith.extui %9 : i1 to i32
    %c0_i32_9 = arith.constant 0 : i32
    %11 = arith.cmpi ne, %10, %c0_i32_9 : i32
    scf.if %11 {
      %c0_10 = arith.constant 0 : index
      %c0_11 = arith.constant 0 : index
      %12 = vector.load %arg16[%c0_10, %c0_11] : memref<16x128xf32, #tpu.memory_space<vmem>>, vector<16x128xf32>
      %13 = arith.truncf %12 : vector<16x128xf32> to vector<16x128xbf16>
      %c0_12 = arith.constant 0 : index
      %c0_13 = arith.constant 0 : index
      %14 = vector.load %arg5[%c0_12, %c0_13] : memref<128x128xbf16, #tpu.memory_space<vmem>>, vector<128x128xbf16>
      %cst_14 = arith.constant dense<0.000000e+00> : vector<16x128xf32>
      %15 = tpu.matmul %13, %14, %cst_14 {dimension_numbers = #tpu.dot_dimension_numbers<[1], [0], [0], [1], [0, 0, 1, 1], [], []>} : vector<16x128xbf16>, vector<128x128xbf16>, vector<16x128xf32> -> vector<16x128xf32>
      %c0_15 = arith.constant 0 : index
      %c0_16 = arith.constant 0 : index
      %16 = vector.load %arg6[%c0_15, %c0_16] : memref<1x128xf32, #tpu.memory_space<vmem>>, vector<1x128xf32>
      %17 = vector.broadcast %16 : vector<1x128xf32> to vector<16x128xf32>
      %18 = arith.addf %15, %17 : vector<16x128xf32>
      %c0_17 = arith.constant 0 : index
      %c0_18 = arith.constant 0 : index
      %19 = vector.load %arg2[%c0_17, %c0_18] : memref<16x128xf32, #tpu.memory_space<vmem>>, vector<16x128xf32>
      %20 = arith.addf %18, %19 : vector<16x128xf32>
      %cst_19 = arith.constant dense<0.000000e+00> : vector<16xf32>
      %21 = vector.multi_reduction <add>, %20, %cst_19 [1] : vector<16x128xf32> to vector<16xf32>
      %22 = vector.shape_cast %21 : vector<16xf32> to vector<16x1xf32>
      %cst_20 = arith.constant 1.280000e+02 : f32
      %23 = vector.broadcast %cst_20 : f32 to vector<16x1xf32>
      %24 = arith.divf %22, %23 : vector<16x1xf32>
      %25 = vector.broadcast %24 : vector<16x1xf32> to vector<16x128xf32>
      %26 = arith.subf %20, %25 : vector<16x128xf32>
      %27 = vector.broadcast %24 : vector<16x1xf32> to vector<16x128xf32>
      %28 = arith.subf %20, %27 : vector<16x128xf32>
      %29 = arith.mulf %26, %28 : vector<16x128xf32>
      %cst_21 = arith.constant dense<0.000000e+00> : vector<16xf32>
      %30 = vector.multi_reduction <add>, %29, %cst_21 [1] : vector<16x128xf32> to vector<16xf32>
      %31 = vector.shape_cast %30 : vector<16xf32> to vector<16x1xf32>
      %cst_22 = arith.constant 1.280000e+02 : f32
      %32 = vector.broadcast %cst_22 : f32 to vector<16x1xf32>
      %33 = arith.divf %31, %32 : vector<16x1xf32>
      %34 = vector.broadcast %24 : vector<16x1xf32> to vector<16x128xf32>
      %35 = arith.subf %20, %34 : vector<16x128xf32>
      %cst_23 = arith.constant 9.99999974E-6 : f32
      %36 = vector.broadcast %cst_23 : f32 to vector<16x1xf32>
      %37 = arith.addf %33, %36 : vector<16x1xf32>
      %38 = math.rsqrt %37 : vector<16x1xf32>
      %39 = vector.broadcast %38 : vector<16x1xf32> to vector<16x128xf32>
      %40 = arith.mulf %35, %39 : vector<16x128xf32>
      %c0_24 = arith.constant 0 : index
      %c0_25 = arith.constant 0 : index
      %41 = vector.load %arg7[%c0_24, %c0_25] : memref<1x128xf32, #tpu.memory_space<vmem>>, vector<1x128xf32>
      %42 = vector.broadcast %41 : vector<1x128xf32> to vector<16x128xf32>
      %43 = arith.mulf %40, %42 : vector<16x128xf32>
      %c0_26 = arith.constant 0 : index
      %c0_27 = arith.constant 0 : index
      %44 = vector.load %arg8[%c0_26, %c0_27] : memref<1x128xf32, #tpu.memory_space<vmem>>, vector<1x128xf32>
      %45 = vector.broadcast %44 : vector<1x128xf32> to vector<16x128xf32>
      %46 = arith.addf %43, %45 : vector<16x128xf32>
      %47 = arith.truncf %46 : vector<16x128xf32> to vector<16x128xbf16>
      %cst_28 = arith.constant 0.000000e+00 : f32
      %48 = vector.broadcast %cst_28 : f32 to vector<16x128xf32>
      %c0_29 = arith.constant 0 : index
      %c0_30 = arith.constant 0 : index
      %49 = vector.load %arg9[%c0_29, %c0_30] : memref<128x512xbf16, #tpu.memory_space<vmem>>, vector<128x512xbf16>
      %cst_31 = arith.constant dense<0.000000e+00> : vector<16x512xf32>
      %50 = tpu.matmul %47, %49, %cst_31 {dimension_numbers = #tpu.dot_dimension_numbers<[1], [0], [0], [1], [0, 0, 1, 1], [], []>} : vector<16x128xbf16>, vector<128x512xbf16>, vector<16x512xf32> -> vector<16x512xf32>
      %c0_32 = arith.constant 0 : index
      %c0_33 = arith.constant 0 : index
      %51 = vector.load %arg10[%c0_32, %c0_33] : memref<1x512xf32, #tpu.memory_space<vmem>>, vector<1x512xf32>
      %52 = vector.broadcast %51 : vector<1x512xf32> to vector<16x512xf32>
      %53 = arith.addf %50, %52 : vector<16x512xf32>
      %54 = arith.negf %53 : vector<16x512xf32>
      %55 = math.exp %54 : vector<16x512xf32>
      %cst_34 = arith.constant 1.000000e+00 : f32
      %56 = vector.broadcast %cst_34 : f32 to vector<16x512xf32>
      %57 = arith.addf %56, %55 : vector<16x512xf32>
      %58 = arith.divf %56, %57 : vector<16x512xf32>
      %59 = arith.mulf %53, %58 : vector<16x512xf32>
      %60 = arith.truncf %59 : vector<16x512xf32> to vector<16x512xbf16>
      %c0_35 = arith.constant 0 : index
      %c0_36 = arith.constant 0 : index
      %61 = vector.load %arg11[%c0_35, %c0_36] : memref<512x128xbf16, #tpu.memory_space<vmem>>, vector<512x128xbf16>
      %cst_37 = arith.constant dense<0.000000e+00> : vector<16x128xf32>
      %62 = tpu.matmul %60, %61, %cst_37 {dimension_numbers = #tpu.dot_dimension_numbers<[1], [0], [0], [1], [0, 0, 1, 1], [], []>} : vector<16x512xbf16>, vector<512x128xbf16>, vector<16x128xf32> -> vector<16x128xf32>
      %63 = arith.addf %48, %62 : vector<16x128xf32>
      %c0_38 = arith.constant 0 : index
      %c0_39 = arith.constant 0 : index
      %64 = vector.load %arg12[%c0_38, %c0_39] : memref<1x128xf32, #tpu.memory_space<vmem>>, vector<1x128xf32>
      %65 = vector.broadcast %64 : vector<1x128xf32> to vector<16x128xf32>
      %66 = arith.addf %63, %65 : vector<16x128xf32>
      %67 = arith.addf %66, %46 : vector<16x128xf32>
      %cst_40 = arith.constant dense<0.000000e+00> : vector<16xf32>
      %68 = vector.multi_reduction <add>, %67, %cst_40 [1] : vector<16x128xf32> to vector<16xf32>
      %69 = vector.shape_cast %68 : vector<16xf32> to vector<16x1xf32>
      %cst_41 = arith.constant 1.280000e+02 : f32
      %70 = vector.broadcast %cst_41 : f32 to vector<16x1xf32>
      %71 = arith.divf %69, %70 : vector<16x1xf32>
      %72 = vector.broadcast %71 : vector<16x1xf32> to vector<16x128xf32>
      %73 = arith.subf %67, %72 : vector<16x128xf32>
      %74 = vector.broadcast %71 : vector<16x1xf32> to vector<16x128xf32>
      %75 = arith.subf %67, %74 : vector<16x128xf32>
      %76 = arith.mulf %73, %75 : vector<16x128xf32>
      %cst_42 = arith.constant dense<0.000000e+00> : vector<16xf32>
      %77 = vector.multi_reduction <add>, %76, %cst_42 [1] : vector<16x128xf32> to vector<16xf32>
      %78 = vector.shape_cast %77 : vector<16xf32> to vector<16x1xf32>
      %cst_43 = arith.constant 1.280000e+02 : f32
      %79 = vector.broadcast %cst_43 : f32 to vector<16x1xf32>
      %80 = arith.divf %78, %79 : vector<16x1xf32>
      %81 = vector.broadcast %71 : vector<16x1xf32> to vector<16x128xf32>
      %82 = arith.subf %67, %81 : vector<16x128xf32>
      %cst_44 = arith.constant 9.99999974E-6 : f32
      %83 = vector.broadcast %cst_44 : f32 to vector<16x1xf32>
      %84 = arith.addf %80, %83 : vector<16x1xf32>
      %85 = math.rsqrt %84 : vector<16x1xf32>
      %86 = vector.broadcast %85 : vector<16x1xf32> to vector<16x128xf32>
      %87 = arith.mulf %82, %86 : vector<16x128xf32>
      %c0_45 = arith.constant 0 : index
      %c0_46 = arith.constant 0 : index
      %88 = vector.load %arg13[%c0_45, %c0_46] : memref<1x128xf32, #tpu.memory_space<vmem>>, vector<1x128xf32>
      %89 = vector.broadcast %88 : vector<1x128xf32> to vector<16x128xf32>
      %90 = arith.mulf %87, %89 : vector<16x128xf32>
      %c0_47 = arith.constant 0 : index
      %c0_48 = arith.constant 0 : index
      %91 = vector.load %arg14[%c0_47, %c0_48] : memref<1x128xf32, #tpu.memory_space<vmem>>, vector<1x128xf32>
      %92 = vector.broadcast %91 : vector<1x128xf32> to vector<16x128xf32>
      %93 = arith.addf %90, %92 : vector<16x128xf32>
      %c0_49 = arith.constant 0 : index
      %c0_50 = arith.constant 0 : index
      %94 = vector.load %arg15[%c0_49, %c0_50] : memref<16x128xf32, #tpu.memory_space<vmem>>, vector<16x128xf32>
      tpu.vector_store %arg15[%c0_49, %c0_50], %93 {strides = array<i32>} : memref<16x128xf32, #tpu.memory_space<vmem>>, vector<16x128xf32>,
    } else {
    }
    return
  }
  func.func @transform_0(%arg0: i32, %arg1: i32) -> (i32, i32) {
    %c0_i32 = arith.constant 0 : i32
    %c0_i32_0 = arith.constant 0 : i32
    return %arg0, %c0_i32 : i32, i32
  }
  func.func @transform_1(%arg0: i32, %arg1: i32) -> (i32, i32) {
    %c0_i32 = arith.constant 0 : i32
    return %arg0, %arg1 : i32, i32
  }
  func.func @transform_2(%arg0: i32, %arg1: i32) -> (i32, i32) {
    %c0_i32 = arith.constant 0 : i32
    %c0_i32_0 = arith.constant 0 : i32
    return %arg1, %c0_i32 : i32, i32
  }
  func.func @transform_3(%arg0: i32, %arg1: i32) -> (i32, i32) {
    %c0_i32 = arith.constant 0 : i32
    %c0_i32_0 = arith.constant 0 : i32
    %c0_i32_1 = arith.constant 0 : i32
    return %c0_i32, %c0_i32_0 : i32, i32
  }
  func.func @transform_4(%arg0: i32, %arg1: i32) -> (i32, i32) {
    %c0_i32 = arith.constant 0 : i32
    %c0_i32_0 = arith.constant 0 : i32
    %c0_i32_1 = arith.constant 0 : i32
    return %c0_i32, %c0_i32_0 : i32, i32
  }
  func.func @transform_5(%arg0: i32, %arg1: i32) -> (i32, i32) {
    %c0_i32 = arith.constant 0 : i32
    %c0_i32_0 = arith.constant 0 : i32
    %c0_i32_1 = arith.constant 0 : i32
    return %c0_i32, %c0_i32_0 : i32, i32
  }
  func.func @transform_6(%arg0: i32, %arg1: i32) -> (i32, i32) {
    %c0_i32 = arith.constant 0 : i32
    %c0_i32_0 = arith.constant 0 : i32
    %c0_i32_1 = arith.constant 0 : i32
    return %c0_i32, %c0_i32_0 : i32, i32
  }
  func.func @transform_7(%arg0: i32, %arg1: i32) -> (i32, i32) {
    %c0_i32 = arith.constant 0 : i32
    %c0_i32_0 = arith.constant 0 : i32
    %c0_i32_1 = arith.constant 0 : i32
    return %c0_i32, %c0_i32_0 : i32, i32
  }
  func.func @transform_8(%arg0: i32, %arg1: i32) -> (i32, i32) {
    %c0_i32 = arith.constant 0 : i32
    %c0_i32_0 = arith.constant 0 : i32
    %c0_i32_1 = arith.constant 0 : i32
    return %c0_i32, %c0_i32_0 : i32, i32
  }
  func.func @transform_9(%arg0: i32, %arg1: i32) -> (i32, i32) {
    %c0_i32 = arith.constant 0 : i32
    %c0_i32_0 = arith.constant 0 : i32
    %c0_i32_1 = arith.constant 0 : i32
    return %c0_i32, %c0_i32_0 : i32, i32
  }
  func.func @transform_10(%arg0: i32, %arg1: i32) -> (i32, i32) {
    %c0_i32 = arith.constant 0 : i32
    %c0_i32_0 = arith.constant 0 : i32
    %c0_i32_1 = arith.constant 0 : i32
    return %c0_i32, %c0_i32_0 : i32, i32
  }
  func.func @transform_11(%arg0: i32, %arg1: i32) -> (i32, i32) {
    %c0_i32 = arith.constant 0 : i32
    %c0_i32_0 = arith.constant 0 : i32
    %c0_i32_1 = arith.constant 0 : i32
    return %c0_i32, %c0_i32_0 : i32, i32
  }
  func.func @transform_12(%arg0: i32, %arg1: i32) -> (i32, i32) {
    %c0_i32 = arith.constant 0 : i32
    %c0_i32_0 = arith.constant 0 : i32
    %c0_i32_1 = arith.constant 0 : i32
    return %c0_i32, %c0_i32_0 : i32, i32
  }
  func.func @transform_13(%arg0: i32, %arg1: i32) -> (i32, i32) {
    %c0_i32 = arith.constant 0 : i32
    %c0_i32_0 = arith.constant 0 : i32
    return %arg0, %c0_i32 : i32, i32
  }
}

</mosaic_0001>

<bundles_post_ra>
// kernel: graph_conv_encoder_layer.1
= control target key start
LH: loop header
LB: loop body
LE: loop exit
PB: predicated region body
PF: predicated region fallthrough
CT: control target
= control target key end

     0   :  { %vm69_vm0 = vcmask 130048   ;;  %s2138_s0 = inlined_call_operand.vmem [shape: f32[16,128], index: 0, kind: input, shape index: {}]   ;;  %s2139_s1 = inlined_call_operand.vmem [shape: bf16[16,16], index: 1, kind: input, shape index: {}]   ;;  %s2140_s2 = inlined_call_operand.vmem [shape: bf16[16,128], index: 2, kind: input, shape index: {}]   ;;  %s2141_s3 = inlined_call_operand.vmem [shape: bf16[128,128], index: 3, kind: input, shape index: {}]   ;;  %s2142_s4 = inlined_call_operand.vmem [shape: f32[1,128], index: 4, kind: input, shape index: {}]   ;;  %s2143_s5 = inlined_call_operand.vmem [shape: f32[1,128], index: 5, kind: input, shape index: {}]   ;;  %s2144_s6 = inlined_call_operand.vmem [shape: f32[1,128], index: 6, kind: input, shape index: {}]   ;;  %s2145_s7 = inlined_call_operand.vmem [shape: bf16[128,512], index: 7, kind: input, shape index: {}]   ;;  %s2146_s8 = inlined_call_operand.vmem [shape: f32[1,512], index: 8, kind: input, shape index: {}]   ;;  %s2147_s9 = inlined_call_operand.vmem [shape: bf16[512,128], index: 9, kind: input, shape index: {}]   ;;  %s2148_s10 = inlined_call_operand.vmem [shape: f32[1,128], index: 10, kind: input, shape index: {}]   ;;  %s2149_s11 = inlined_call_operand.vmem [shape: f32[1,128], index: 11, kind: input, shape index: {}]   ;;  %s2150_s12 = inlined_call_operand.vmem [shape: f32[1,128], index: 12, kind: input, shape index: {}]   ;;  %s2151_s13 = inlined_call_operand.hbm [shape: f32[16,128], index: 13, kind: output, shape index: {}]  }
   0x1   :  { %v1361_v0 = vld [vmem:[%s2140_s2] sm:$0xff]  ;;  %v1369_v1 = vld [vmem:[%s2141_s3 + $0x38] sm:$0xff]  ;;  %v1368_v3 = vld [vmem:[%s2141_s3 + $0x30] sm:$0xff] }
   0x2   :  { %v1360_v2 = vld [vmem:[%s2139_s1] sm:$0xff]  ;;  %80 = vmatpush.bf16.msra.mxu0 %v1361_v0  ;;  %165 = vmatpush.bf16.msra.mxu1 %v1369_v1 }
   0x3   :  { %18 = vsyncpa [#allocation4], 0  ;;  %v1367_v4 = vld [vmem:[%s2141_s3 + $0x28] sm:$0xff]  ;;  %v1366_v5 = vld [vmem:[%s2141_s3 + $0x20] sm:$0xff]  ;;  %v1512_v22 = vmov 128.0   ;;  %s1043_s27 = sshll.u32 %s2151_s13, 4  ;;  %s1044_s27 = int_to_ptr.hbm [resolvable:$true] %s1043_s27 }
   0x4   :  { %v1365_v6 = vld [vmem:[%s2141_s3 + $0x18] sm:$0xff]  ;;  %v1364_v7 = vld [vmem:[%s2141_s3 + $0x10] sm:$0xff]  ;;  %v1363_v8 = vld [vmem:[%s2141_s3 + $0x8] sm:$0xff]  ;;  %1444 = vrcp.f32 %v1512_v22 }
   0x5   :  { %1063 = vmatmul.msk.bf16.vlgmr.msra.gmra.mxu0 %vm69_vm0, %v1360_v2  ;;  %v1362_v9 = vld [vmem:[%s2141_s3] sm:$0xff]  ;;  %v180_v19 = vld [vmem:[%s2138_s0 + $0x8] sm:$0xff]  ;;  %v1400_v38 = vld [vmem:[%s2145_s7 + $0xec] sm:$0xf0] }
   0x6   :  { %166 = vmatpush.bf16.msra.mxu1 %v1368_v3  ;;  %v1438_v13 = vld [vmem:[%s2142_s4] ss:$0 sm:$0xff]  ;;  %v1398_v39 = vld [vmem:[%s2145_s7 + $0xe4] sm:$0xf]  ;;  %v1212_v41 = vld [vmem:[%s2145_s7 + $0xf0] sm:$0xf0] }
   0x7   :  { %v179_v15 = vld [vmem:[%s2138_s0] sm:$0xff]  ;;  %v1218_v42 = vld [vmem:[%s2145_s7 + $0xe8] sm:$0xf]  ;;  %v1401_v43 = vld [vmem:[%s2145_s7 + $0xf4] sm:$0xf0]  ;;  %v1215_v44 = vor.u32 %v1398_v39, %v1212_v41 }
   0x8   :  { %v1210_v37 = vld [vmem:[%s2145_s7 + $0xe0] sm:$0xf]  ;;  %v1219_v45 = vor.u32 %v1401_v43, %v1218_v42  ;;  %v1399_v46 = vld [vmem:[%s2145_s7 + $0xec] sm:$0xf]  ;;  %v1220_v47 = vld [vmem:[%s2145_s7 + $0xf8] sm:$0xf0] }
   0x9   :  { %v1211_v40 = vor.u32 %v1400_v38, %v1210_v37  ;;  %v1223_v48 = vor.u32 %v1399_v46, %v1220_v47  ;;  %459 = vmatpush.bf16.msra.mxu3 %v1215_v44  ;;  %v1194_v49 = vld [vmem:[%s2145_s7 + $0xc0] sm:$0xf]  ;;  %v1396_v50 = vld [vmem:[%s2145_s7 + $0xcc] sm:$0xf0]  ;;  %v1394_v51 = vld [vmem:[%s2145_s7 + $0xc4] sm:$0xf] }
   0xa   :  { %167 = vmatpush.bf16.msra.mxu1 %v1367_v4  ;;  %v1445_v23 = vpop.eup %1444  ;;  %473 = vmatpush.bf16.msrb.mxu0 %v1219_v45  ;;  %v1195_v52 = vor.u32 %v1396_v50, %v1194_v49  ;;  %v1196_v53 = vld [vmem:[%s2145_s7 + $0xd0] sm:$0xf0]  ;;  %v1202_v54 = vld [vmem:[%s2145_s7 + $0xc8] sm:$0xf]  ;;  %v1397_v55 = vld [vmem:[%s2145_s7 + $0xd4] sm:$0xf0] }
   0xb   :  { %v188_v24 = vmul.f32 128.0, %v1445_v23  ;;  %vm192_vm1 = vweird.f32 %v1445_v23  ;;  %445 = vmatpush.bf16.msra.mxu2 %v1211_v40  ;;  %v1199_v56 = vor.u32 %v1394_v51, %v1196_v53  ;;  %v1203_v57 = vor.u32 %v1397_v55, %v1202_v54  ;;  %v1395_v58 = vld [vmem:[%s2145_s7 + $0xcc] sm:$0xf]  ;;  %v1204_v59 = vld [vmem:[%s2145_s7 + $0xd8] sm:$0xf0] }
   0xc   :  { %v1207_v60 = vor.u32 %v1395_v58, %v1204_v59  ;;  %v1178_v61 = vld [vmem:[%s2145_s7 + $0xa0] sm:$0xf]  ;;  %v1392_v62 = vld [vmem:[%s2145_s7 + $0xac] sm:$0xf0]  ;;  %v1390_v63 = vld [vmem:[%s2145_s7 + $0xa4] sm:$0xf] }
   0xd   :  { %v189_v25 = vsub.f32 1.0, %v188_v24  ;;  %460 = vmatpush.bf16.msra.mxu3 %v1199_v56  ;;  %v1179_v0 = vor.u32 %v1392_v62, %v1178_v61  ;;  %v1180_v1 = vld [vmem:[%s2145_s7 + $0xb0] sm:$0xf0]  ;;  %v1186_v2 = vld [vmem:[%s2145_s7 + $0xa8] sm:$0xf] }
   0xe   :  { %168 = vmatpush.bf16.msra.mxu1 %v1366_v5  ;;  %474 = vmatpush.bf16.msrb.mxu0 %v1203_v57  ;;  %v1393_v3 = vld [vmem:[%s2145_s7 + $0xb4] sm:$0xf0]  ;;  %v1183_v4 = vor.u32 %v1390_v63, %v1180_v1  ;;  %v1384_v22 = vld [vmem:[%s2145_s7 + $0x6c] sm:$0xf0]  ;;  %v1378_v38 = vld [vmem:[%s2145_s7 + $0x44] sm:$0xf] }
   0xf   :  { %v190_v26 = vmul.f32 %v1445_v23, %v189_v25  ;;  %446 = vmatpush.bf16.msra.mxu2 %v1195_v52  ;;  %v1187_v5 = vor.u32 %v1393_v3, %v1186_v2  ;;  %v1148_v25 = vld [vmem:[%s2145_s7 + $0x70] sm:$0xf0]  ;;  %v1380_v37 = vld [vmem:[%s2145_s7 + $0x4c] sm:$0xf0]  ;;  %v1138_v41 = vld [vmem:[%s2145_s7 + $0x48] sm:$0xf] }
  0x10   :  { %v1132_v40 = vld [vmem:[%s2145_s7 + $0x50] sm:$0xf0]  ;;  %v1381_v42 = vld [vmem:[%s2145_s7 + $0x54] sm:$0xf0]  ;;  %v1379_v45 = vld [vmem:[%s2145_s7 + $0x4c] sm:$0xf] }
  0x11   :  { %v191_v27 = vadd.f32 %v1445_v23, %v190_v26  ;;  %461 = vmatpush.bf16.msra.mxu3 %v1183_v4  ;;  %v1154_v26 = vld [vmem:[%s2145_s7 + $0x68] sm:$0xf]  ;;  %v1135_v43 = vor.u32 %v1378_v38, %v1132_v40  ;;  %v1139_v44 = vor.u32 %v1381_v42, %v1138_v41  ;;  %v1140_v46 = vld [vmem:[%s2145_s7 + $0x58] sm:$0xf0]  ;;  %v1376_v49 = vld [vmem:[%s2145_s7 + $0x2c] sm:$0xf0] }
  0x12   :  { %169 = vmatpush.bf16.msra.mxu1 %v1365_v6  ;;  %v1391_v6 = vld [vmem:[%s2145_s7 + $0xac] sm:$0xf]  ;;  %475 = vmatpush.bf16.msrb.mxu0 %v1187_v5  ;;  %v1143_v47 = vor.u32 %v1379_v45, %v1140_v46  ;;  %v1374_v50 = vld [vmem:[%s2145_s7 + $0x24] sm:$0xf]  ;;  %v1116_v52 = vld [vmem:[%s2145_s7 + $0x30] sm:$0xf0] }
  0x13   :  { %v1625_v28 = vsel %vm192_vm1, %v1445_v23, %v191_v27  ;;  %447 = vmatpush.bf16.msra.mxu2 %v1179_v0  ;;  %v1382_v23 = vld [vmem:[%s2145_s7 + $0x64] sm:$0xf]  ;;  %v1385_v27 = vld [vmem:[%s2145_s7 + $0x74] sm:$0xf0]  ;;  %v1122_v53 = vld [vmem:[%s2145_s7 + $0x28] sm:$0xf]  ;;  %v1119_v55 = vor.u32 %v1374_v50, %v1116_v52 }
  0x14   :  { %v1377_v54 = vld [vmem:[%s2145_s7 + $0x34] sm:$0xf0]  ;;  %v1375_v57 = vld [vmem:[%s2145_s7 + $0x2c] sm:$0xf]  ;;  %v1124_v58 = vld [vmem:[%s2145_s7 + $0x38] sm:$0xf0] }
  0x15   :  { %v1123_v56 = vor.u32 %v1377_v54, %v1122_v53  ;;  %v1098_v59 = vld [vmem:[%s2145_s7] sm:$0xf]  ;;  %v1127_v61 = vor.u32 %v1375_v57, %v1124_v58  ;;  %v1372_v62 = vld [vmem:[%s2145_s7 + $0xc] sm:$0xf0]  ;;  %v1370_v63 = vld [vmem:[%s2145_s7 + $0x4] sm:$0xf] }
  0x16   :  { %170 = vmatpush.bf16.msra.mxu1 %v1364_v7  ;;  %v1188_v7 = vld [vmem:[%s2145_s7 + $0xb8] sm:$0xf0]  ;;  %v1100_v0 = vld [vmem:[%s2145_s7 + $0x10] sm:$0xf0]  ;;  %v1099_v2 = vor.u32 %v1372_v62, %v1098_v59  ;;  %v1106_v4 = vld [vmem:[%s2145_s7 + $0x8] sm:$0xf] }
  0x17   :  { %v1103_v3 = vor.u32 %v1370_v63, %v1100_v0  ;;  %v1373_v5 = vld [vmem:[%s2145_s7 + $0x14] sm:$0xf0]  ;;  %v1854_v40 = vld [vmem:[%s2146_s8] sm:$0xf]  ;;  %v1431_v52 = vld [vmem:[%s2147_s9 + $0xe8] sm:$0xff] }
  0x18   :  { %v279_v41 = vperm.slane %v1854_v40, 2  ;;  %v280_v42 = vperm.slane %v1854_v40, 3  ;;  %v1409_v45 = vld [vmem:[%s2147_s9 + $0x38] sm:$0xff]  ;;  %v277_v53 = vperm.slane %v1854_v40, 0  ;;  %v278_v54 = vperm.slane %v1854_v40, 1  ;;  %v1408_v57 = vld [vmem:[%s2147_s9 + $0x30] sm:$0xff] }
  0x19   :  { %v1417_v46 = vld [vmem:[%s2147_s9 + $0x78] sm:$0xff]  ;;  %v1416_v58 = vld [vmem:[%s2147_s9 + $0x70] sm:$0xff]  ;;  %v1430_v62 = vld [vmem:[%s2147_s9 + $0xe0] sm:$0xff] }
  0x1a   :  { %171 = vmatpush.bf16.msra.mxu1 %v1363_v8  ;;  %v1191_v8 = vor.u32 %v1391_v6, %v1188_v7  ;;  %v1371_v6 = vld [vmem:[%s2145_s7 + $0xc] sm:$0xf]  ;;  %v1107_v7 = vor.u32 %v1373_v5, %v1106_v4  ;;  %v1410_v40 = vld [vmem:[%s2147_s9 + $0x40] sm:$0xff] }
  0x1e   :  { %172 = vmatpush.bf16.msra.mxu1 %v1362_v9  ;;  %v1162_v9 = vld [vmem:[%s2145_s7 + $0x80] sm:$0xf] }
  0x22   :  { %487 = vmatpush.bf16.msrb.mxu1 %v1223_v48  ;;  %v1114_v48 = vld [vmem:[%s2145_s7 + $0x20] sm:$0xf] }
  0x23   :  { %v1115_v51 = vor.u32 %v1376_v49, %v1114_v48 }
  0x26   :  { %488 = vmatpush.bf16.msrb.mxu1 %v1207_v60 }
  0x2a   :  { %489 = vmatpush.bf16.msrb.mxu1 %v1191_v8  ;;  %v1108_v8 = vld [vmem:[%s2145_s7 + $0x18] sm:$0xf0] }
  0x82   :  { %v82_v10 = vpop.f32.mrf.mxu0 }
  0x8a   :  { %v84_v11 = vpop.f32.mrf.mxu0 }
  0x8b   :  { %v96_v12 = vpack.c.bf16 %v84_v11, %v82_v10  ;;  %v1388_v10 = vld [vmem:[%s2145_s7 + $0x8c] sm:$0xf0]  ;;  %v1386_v11 = vld [vmem:[%s2145_s7 + $0x84] sm:$0xf] }
  0x8d   :  { %173 = vmatmul.bf16.vlgmr.msra.gmra.mxu1 %v96_v12  ;;  %v1163_v12 = vor.u32 %v1388_v10, %v1162_v9  ;;  %v1111_v10 = vor.u32 %v1371_v6, %v1108_v8 }
  0x8f   :  { %448 = vmatpush.bf16.msra.mxu2 %v1163_v12 }
 0x10a   :  { %v174_v14 = vpop.f32.mrf.mxu1 }
 0x10b   :  { %v175_v16 = vadd.f32 %v1438_v13, %v174_v14  ;;  %v1170_v14 = vld [vmem:[%s2145_s7 + $0x88] sm:$0xf] }
 0x10d   :  { %v181_v17 = vadd.f32 %v179_v15, %v175_v16  ;;  %v1389_v15 = vld [vmem:[%s2145_s7 + $0x94] sm:$0xf0] }
 0x10f   :  { %183 = vadd.xlane.f32.xlu0 %v181_v17 }
 0x112   :  { %v176_v18 = vpop.f32.mrf.mxu1 }
 0x113   :  { %v177_v20 = vadd.f32 %v1438_v13, %v176_v18  ;;  %v1164_v13 = vld [vmem:[%s2145_s7 + $0x90] sm:$0xf0]  ;;  %v1387_v18 = vld [vmem:[%s2145_s7 + $0x8c] sm:$0xf] }
 0x114   :  { %v1167_v16 = vor.u32 %v1386_v11, %v1164_v13 }
 0x115   :  { %v182_v21 = vadd.f32 %v180_v19, %v177_v20  ;;  %v1172_v19 = vld [vmem:[%s2145_s7 + $0x98] sm:$0xf0] }
 0x116   :  { %v1175_v20 = vor.u32 %v1387_v18, %v1172_v19  ;;  %462 = vmatpush.bf16.msra.mxu3 %v1167_v16 }
 0x117   :  { %185 = vadd.xlane.f32.xlu0 %v182_v21 }
 0x118   :  { %490 = vmatpush.bf16.msrb.mxu1 %v1175_v20 }
 0x182   :  { %v184_v29 = vpop.xlane.xlu0 %183 }
 0x183   :  { %v194_v30 = vmul.f32 %v1625_v28, %v184_v29  ;;  %v1151_v29 = vor.u32 %v1382_v23, %v1148_v25 }
 0x185   :  { %v1628_v31 = vsub.f32 %v181_v17, %v194_v30  ;;  %v1171_v17 = vor.u32 %v1389_v15, %v1170_v14  ;;  %v1155_v30 = vor.u32 %v1385_v27, %v1154_v26  ;;  %463 = vmatpush.bf16.msra.mxu3 %v1151_v29  ;;  %v1439_v27 = vld [vmem:[%s2143_s5] ss:$0 sm:$0xff] }
 0x187   :  { %v198_v32 = vmul.f32 %v1628_v31, %v1628_v31  ;;  %476 = vmatpush.bf16.msrb.mxu0 %v1171_v17 }
 0x189   :  { %200 = vadd.xlane.f32.xlu1 %v198_v32  ;;  %v1383_v32 = vld [vmem:[%s2145_s7 + $0x6c] sm:$0xf]  ;;  %464 = vmatpush.bf16.msra.mxu3 %v1135_v43  ;;  %v1424_v43 = vld [vmem:[%s2147_s9 + $0xb0] sm:$0xff] }
 0x18a   :  { %v186_v33 = vpop.xlane.xlu0 %185 }
 0x18b   :  { %v195_v34 = vmul.f32 %v1625_v28, %v186_v33  ;;  %v1156_v33 = vld [vmem:[%s2145_s7 + $0x78] sm:$0xf0]  ;;  %477 = vmatpush.bf16.msrb.mxu0 %v1155_v30 }
 0x18d   :  { %v1633_v35 = vsub.f32 %v182_v21, %v195_v34  ;;  %v1146_v21 = vld [vmem:[%s2145_s7 + $0x60] sm:$0xf]  ;;  %v1159_v34 = vor.u32 %v1383_v32, %v1156_v33  ;;  %465 = vmatpush.bf16.msra.mxu3 %v1119_v55 }
 0x18e   :  { %v1147_v24 = vor.u32 %v1384_v22, %v1146_v21 }
 0x18f   :  { %v199_v36 = vmul.f32 %v1633_v35, %v1633_v35  ;;  %491 = vmatpush.bf16.msrb.mxu1 %v1159_v34  ;;  %478 = vmatpush.bf16.msrb.mxu0 %v1139_v44  ;;  %v1440_v34 = vld [vmem:[%s2144_s6] ss:$0 sm:$0xff]  ;;  %v1432_v44 = vld [vmem:[%s2147_s9 + $0xf0] sm:$0xff] }
 0x190   :  { %449 = vmatpush.bf16.msra.mxu2 %v1147_v24 }
 0x191   :  { %202 = vadd.xlane.f32.xlu1 %v199_v36  ;;  %v1130_v36 = vld [vmem:[%s2145_s7 + $0x40] sm:$0xf]  ;;  %466 = vmatpush.bf16.msra.mxu3 %v1103_v3  ;;  %s1515_s7 = smov 8  }
 0x192   :  { %v1131_v39 = vor.u32 %v1380_v37, %v1130_v36 }
 0x193   :  { %492 = vmatpush.bf16.msrb.mxu1 %v1143_v47  ;;  %479 = vmatpush.bf16.msrb.mxu0 %v1123_v56 }
 0x194   :  { %450 = vmatpush.bf16.msra.mxu2 %v1131_v39  ;;  %v1433_v39 = vld [vmem:[%s2147_s9 + $0xf8] sm:$0xff] }
 0x195   :  { %939 = vmatpush.bf16.msrb.mxu3 %v1417_v46 }
 0x197   :  { %493 = vmatpush.bf16.msrb.mxu1 %v1127_v61  ;;  %480 = vmatpush.bf16.msrb.mxu0 %v1107_v7  ;;  %v1422_v61 = vld [vmem:[%s2147_s9 + $0xa0] sm:$0xff] }
 0x198   :  { %451 = vmatpush.bf16.msra.mxu2 %v1115_v51  ;;  %v1423_v51 = vld [vmem:[%s2147_s9 + $0xa8] sm:$0xff] }
 0x199   :  { %940 = vmatpush.bf16.msrb.mxu3 %v1416_v58 }
 0x19b   :  { %494 = vmatpush.bf16.msrb.mxu1 %v1111_v10  ;;  %v1429_v10 = vld [vmem:[%s2147_s9 + $0xd8] sm:$0xff] }
 0x19c   :  { %452 = vmatpush.bf16.msra.mxu2 %v1099_v2  ;;  %v1415_v2 = vld [vmem:[%s2147_s9 + $0x68] sm:$0xff] }
 0x19d   :  { %941 = vmatpush.bf16.msrb.mxu3 %v1415_v2 }
 0x19f   :  { %967 = vmatpush.bf16.msra.mxu1 %v1433_v39 }
 0x1a0   :  { %925 = vmatpush.bf16.msrb.mxu2 %v1409_v45 }
 0x1a3   :  { %968 = vmatpush.bf16.msra.mxu1 %v1432_v44 }
 0x1a4   :  { %926 = vmatpush.bf16.msrb.mxu2 %v1408_v57 }
 0x1a7   :  { %969 = vmatpush.bf16.msra.mxu1 %v1431_v52  ;;  %v1411_v52 = vld [vmem:[%s2147_s9 + $0x48] sm:$0xff] }
 0x1ab   :  { %970 = vmatpush.bf16.msra.mxu1 %v1430_v62 }
 0x1af   :  { %971 = vmatpush.bf16.msra.mxu1 %v1429_v10 }
 0x1fc   :  { %v201_v60 = vpop.xlane.xlu1 %200 }
 0x1fd   :  { %v204_v1 = vmul.f32 %v201_v60, %v1625_v28 }
 0x1ff   :  { %v206_v9 = vadd.f32 1e-05, %v204_v1  ;;  %v1407_v1 = vld [vmem:[%s2147_s9 + $0x28] sm:$0xff] }
 0x200   :  { %927 = vmatpush.bf16.msrb.mxu2 %v1407_v1 }
 0x201   :  { %1446 = vrsqrt.f32 %v206_v9  ;;  %vm214_vm3 = vweird.f32 %v206_v9 }
 0x204   :  { %v203_v11 = vpop.xlane.xlu1 %202 }
 0x205   :  { %v205_v12 = vmul.f32 %v203_v11, %v1625_v28 }
 0x207   :  { %v1447_v13 = vpop.eup %1446  ;;  %v207_v14 = vadd.f32 1e-05, %v205_v12 }
 0x208   :  { %v209_v15 = vmul.f32 %v1447_v13, %v206_v9  ;;  %vm215_vm2 = vweird.f32 %v1447_v13  ;;  %v1421_v9 = vld [vmem:[%s2147_s9 + $0x98] sm:$0xff] }
 0x209   :  { %1448 = vrsqrt.f32 %v207_v14  ;;  %vm216_vm4 = vmor %vm214_vm3, %vm215_vm2  ;;  %vm224_vm6 = vweird.f32 %v207_v14 }
 0x20a   :  { %v210_v16 = vmul.f32 %v1447_v13, %v209_v15 }
 0x20c   :  { %v211_v17 = vmul.f32 0.5, %v210_v16 }
 0x20e   :  { %v212_v18 = vsub.f32 1.5, %v211_v17 }
 0x20f   :  { %v1449_v19 = vpop.eup %1448 }
 0x210   :  { %v213_v20 = vmul.f32 %v1447_v13, %v212_v18  ;;  %v219_v21 = vmul.f32 %v1449_v19, %v207_v14  ;;  %vm225_vm5 = vweird.f32 %v1449_v19  ;;  %v1414_v14 = vld [vmem:[%s2147_s9 + $0x60] sm:$0xff] }
 0x211   :  { %vm226_vm7 = vmor %vm224_vm6, %vm225_vm5  ;;  %942 = vmatpush.bf16.msrb.mxu3 %v1414_v14 }
 0x212   :  { %v220_v22 = vmul.f32 %v1449_v19, %v219_v21  ;;  %v217_v23 = vsel %vm216_vm4, %v1447_v13, %v213_v20  ;;  %v1406_v13 = vld [vmem:[%s2147_s9 + $0x20] sm:$0xff]  ;;  %v1420_v20 = vld [vmem:[%s2147_s9 + $0x90] sm:$0xff] }
 0x213   :  { %v228_v26 = vmul.f32 %v217_v23, %v1628_v31  ;;  %928 = vmatpush.bf16.msrb.mxu2 %v1406_v13  ;;  %v1428_v21 = vld [vmem:[%s2147_s9 + $0xd0] sm:$0xff]  ;;  %v1413_v23 = vld [vmem:[%s2147_s9 + $0x58] sm:$0xff] }
 0x214   :  { %v221_v24 = vmul.f32 0.5, %v220_v22  ;;  %972 = vmatpush.bf16.msra.mxu1 %v1428_v21  ;;  %v1405_v22 = vld [vmem:[%s2147_s9 + $0x18] sm:$0xff] }
 0x215   :  { %v234_v33 = vmul.f32 %v1439_v27, %v228_v26  ;;  %943 = vmatpush.bf16.msrb.mxu3 %v1413_v23 }
 0x216   :  { %v222_v25 = vsub.f32 1.5, %v221_v24 }
 0x217   :  { %v1839_v37 = vadd.f32 %v1440_v34, %v234_v33  ;;  %929 = vmatpush.bf16.msrb.mxu2 %v1405_v22  ;;  %v1404_v33 = vld [vmem:[%s2147_s9 + $0x10] sm:$0xff] }
 0x218   :  { %v223_v29 = vmul.f32 %v1449_v19, %v222_v25 }
 0x21a   :  { %v227_v30 = vsel %vm226_vm7, %v1449_v19, %v223_v29  ;;  %v1427_v29 = vld [vmem:[%s2147_s9 + $0xc8] sm:$0xff] }
 0x21b   :  { %v229_v32 = vmul.f32 %v227_v30, %v1633_v35  ;;  %v1425_v35 = vld [vmem:[%s2147_s9 + $0xb8] sm:$0xff]  ;;  %973 = vmatpush.bf16.msra.mxu1 %v1427_v29  ;;  %930 = vmatpush.bf16.msrb.mxu2 %v1404_v33 }
 0x21c   :  { %953 = vmatpush.bf16.msra.mxu0 %v1425_v35 }
 0x21d   :  { %v235_v36 = vmul.f32 %v1439_v27, %v229_v32  ;;  %v1419_v27 = vld [vmem:[%s2147_s9 + $0x88] sm:$0xff] }
 0x21f   :  { %v1841_v38 = vadd.f32 %v1440_v34, %v235_v36  ;;  %v1412_v34 = vld [vmem:[%s2147_s9 + $0x50] sm:$0xff] }
 0x220   :  { %954 = vmatpush.bf16.msra.mxu0 %v1424_v43  ;;  %944 = vmatpush.bf16.msrb.mxu3 %v1412_v34 }
 0x221   :  { %v242_v31 = vpack.c.bf16 %v1841_v38, %v1839_v37 }
 0x223   :  { %453 = vmatmul.bf16.vlgmr.msra.gmra.mxu2 %v242_v31  ;;  %467 = vmatmul.bf16.vlgmr.msra.gmra.mxu3 %v242_v31 }
 0x224   :  { %481 = vmatmul.bf16.vlgmr.msrb.gmra.mxu0 %v242_v31  ;;  %495 = vmatmul.bf16.vlgmr.msrb.gmra.mxu1 %v242_v31 }
 0x225   :  { %955 = vmatpush.bf16.msra.mxu0 %v1423_v51  ;;  %v1403_v51 = vld [vmem:[%s2147_s9 + $0x8] sm:$0xff]  ;;  %945 = vmatpush.bf16.msrb.mxu3 %v1411_v52 }
 0x226   :  { %931 = vmatpush.bf16.msrb.mxu2 %v1403_v51 }
 0x229   :  { %956 = vmatpush.bf16.msra.mxu0 %v1422_v61  ;;  %946 = vmatpush.bf16.msrb.mxu3 %v1410_v40 }
 0x22d   :  { %957 = vmatpush.bf16.msra.mxu0 %v1421_v9 }
 0x231   :  { %958 = vmatpush.bf16.msra.mxu0 %v1420_v20 }
 0x235   :  { %959 = vmatpush.bf16.msra.mxu0 %v1419_v27 }
 0x2a1   :  { %v482_v47 = vpop.f32.mrf.mxu0  ;;  %v496_v48 = vpop.f32.mrf.mxu1 }
 0x2a2   :  { %v1870_v49 = vadd.f32 %v482_v47, %v279_v41  ;;  %v1872_v50 = vadd.f32 %v496_v48, %v280_v42 }
 0x2a4   :  { %v1226_v55 = vmul.f32 -1.442695, %v1870_v49  ;;  %v1227_v56 = vmul.f32 -1.442695, %v1872_v50 }
 0x2a6   :  { %1450 = vpow2.f32 %v1226_v55  ;;  %v454_v59 = vpop.f32.mrf.mxu2  ;;  %v468_v60 = vpop.f32.mrf.mxu3 }
 0x2a7   :  { %1452 = vpow2.f32 %v1227_v56  ;;  %v1896_v63 = vadd.f32 %v454_v59, %v277_v53  ;;  %v1900_v0 = vadd.f32 %v468_v60, %v278_v54  ;;  %v1402_v60 = vld [vmem:[%s2147_s9] sm:$0xff] }
 0x2a8   :  { %932 = vmatpush.bf16.msrb.mxu2 %v1402_v60 }
 0x2a9   :  { %v1224_v3 = vmul.f32 -1.442695, %v1896_v63  ;;  %v1225_v4 = vmul.f32 -1.442695, %v1900_v0  ;;  %v484_v5 = vpop.f32.mrf.mxu0  ;;  %v498_v6 = vpop.f32.mrf.mxu1 }
 0x2aa   :  { %v1910_v7 = vadd.f32 %v484_v5, %v279_v41  ;;  %v1912_v8 = vadd.f32 %v498_v6, %v280_v42  ;;  %v1418_v41 = vld [vmem:[%s2147_s9 + $0x80] sm:$0xff] }
 0x2ab   :  { %1454 = vpow2.f32 %v1224_v3  ;;  %v1426_v42 = vld [vmem:[%s2147_s9 + $0xc0] sm:$0xff]  ;;  %960 = vmatpush.bf16.msra.mxu0 %v1418_v41 }
 0x2ac   :  { %v1451_v11 = vpop.eup %1450  ;;  %v1230_v12 = vmul.f32 -1.442695, %v1910_v7  ;;  %1456 = vpow2.f32 %v1225_v4  ;;  %v1231_v17 = vmul.f32 -1.442695, %v1912_v8  ;;  %974 = vmatpush.bf16.msra.mxu1 %v1426_v42 }
 0x2ad   :  { %v1453_v15 = vpop.eup %1452  ;;  %v1927_v16 = vadd.f32 1.0, %v1451_v11 }
 0x2ae   :  { %v1930_v18 = vadd.f32 1.0, %v1453_v15  ;;  %1458 = vpow2.f32 %v1230_v12  ;;  %v456_v19 = vpop.f32.mrf.mxu2  ;;  %v470_v45 = vpop.f32.mrf.mxu3 }
 0x2af   :  { %1460 = vrcp.f32 %v1927_v16  ;;  %v1946_v25 = vadd.f32 %v456_v19, %v277_v53  ;;  %v1993_v55 = vadd.f32 %v470_v45, %v278_v54  ;;  %v572_v59 = vand.u32 2147483647, %v1927_v16 }
 0x2b0   :  { %1462 = vrcp.f32 %v1930_v18  ;;  %v574_v54 = vand.u32 2147483648, %v1927_v16  ;;  %v587_v61 = vand.u32 2147483647, %v1930_v18  ;;  %v589_v62 = vand.u32 2147483648, %v1930_v18 }
 0x2b1   :  { %v1455_v24 = vpop.eup %1454  ;;  %1464 = vpow2.f32 %v1231_v17  ;;  %v1228_v31 = vmul.f32 -1.442695, %v1946_v25  ;;  %v1229_v1 = vmul.f32 -1.442695, %v1993_v55  ;;  %vm568_vm9 = vweird.f32 %v1927_v16 }
 0x2b2   :  { %v1948_v26 = vadd.f32 1.0, %v1455_v24  ;;  %v1457_v30 = vpop.eup %1456  ;;  %vm2017_vm10 = vcmp.eq.f32.partialorder %v572_v59, 8.507059e+37  ;;  %vm583_vm11 = vweird.f32 %v1930_v18  ;;  %v575_v10 = vor.u32 1.1754944e-38, %v574_v54 }
 0x2b3   :  { %v1978_v47 = vadd.f32 1.0, %v1457_v30  ;;  %vm2022_vm12 = vcmp.eq.f32.partialorder %v587_v61, 8.507059e+37  ;;  %v590_v12 = vor.u32 1.1754944e-38, %v589_v62 }
 0x2b4   :  { %v1459_v32 = vpop.eup %1458  ;;  %1466 = vrcp.f32 %v1948_v26  ;;  %v544_v24 = vand.u32 2147483648, %v1948_v26  ;;  %v542_v62 = vand.u32 2147483647, %v1948_v26 }
 0x2b5   :  { %v1962_v36 = vpop.eup %1460  ;;  %v1980_v48 = vadd.f32 1.0, %v1459_v32  ;;  %1468 = vpow2.f32 %v1228_v31 }
 0x2b6   :  { %v1965_v35 = vpop.eup %1462  ;;  %v564_v39 = vmul.f32 %v1962_v36, %v1927_v16  ;;  %vm569_vm8 = vweird.f32 %v1962_v36 }
 0x2b7   :  { %v1465_v43 = vpop.eup %1464  ;;  %v579_v44 = vmul.f32 %v1965_v35, %v1930_v18  ;;  %1470 = vrcp.f32 %v1980_v48  ;;  %vm2029_vm13 = vmor %vm568_vm9, %vm569_vm8  ;;  %vm584_vm14 = vweird.f32 %v1965_v35  ;;  %v632_v16 = vand.u32 2147483647, %v1980_v48 }
 0x2b8   :  { %v565_v46 = vsub.f32 1.0, %v564_v39  ;;  %v1988_v53 = vadd.f32 1.0, %v1465_v43  ;;  %1472 = vrcp.f32 %v1978_v47  ;;  %vm628_vm15 = vweird.f32 %v1980_v48  ;;  %vm2054_vm1 = vmor %vm583_vm11, %vm584_vm14 }
 0x2b9   :  { %v580_v57 = vsub.f32 1.0, %v579_v44  ;;  %v634_v27 = vand.u32 2147483648, %v1980_v48  ;;  %vm2059_vm3 = vcmp.eq.f32.partialorder %v632_v16, 8.507059e+37  ;;  %vm538_vm8 = vweird.f32 %v1948_v26 }
 0x2ba   :  { %v566_v56 = vmul.f32 %v1962_v36, %v565_v46  ;;  %v1996_v58 = vpop.eup %1466  ;;  %1474 = vrcp.f32 %v1988_v53  ;;  %v649_v18 = vand.u32 2147483648, %v1988_v53  ;;  %v647_v46 = vand.u32 2147483647, %v1988_v53 }
 0x2bb   :  { %v1469_v2 = vpop.eup %1468  ;;  %v581_v4 = vmul.f32 %v1965_v35, %v580_v57  ;;  %v534_v5 = vmul.f32 %v1996_v58, %v1948_v26  ;;  %1476 = vpow2.f32 %v1229_v1  ;;  %vm539_vm2 = vweird.f32 %v1996_v58 }
 0x2bc   :  { %v567_v3 = vadd.f32 %v1962_v36, %v566_v56  ;;  %v2035_v17 = vadd.f32 1.0, %v1469_v2  ;;  %v635_v44 = vor.u32 1.1754944e-38, %v634_v27  ;;  %vm643_vm6 = vweird.f32 %v1988_v53 }
 0x2bd   :  { %v1471_v6 = vpop.eup %1470  ;;  %v582_v21 = vadd.f32 %v1965_v35, %v581_v4  ;;  %v535_v22 = vsub.f32 1.0, %v534_v5  ;;  %v650_v61 = vor.u32 1.1754944e-38, %v649_v18  ;;  %vm648_vm9 = vcmp.eq.f32.partialorder %v647_v46, 8.507059e+37 }
 0x2be   :  { %v624_v13 = vmul.f32 %v1471_v6, %v1980_v48  ;;  %v2027_v14 = vpop.eup %1472  ;;  %v571_v20 = vsel %vm2029_vm13, %v1962_v36, %v567_v3  ;;  %vm629_vm0 = vweird.f32 %v1471_v6  ;;  %1478 = vrcp.f32 %v2035_v17 }
 0x2bf   :  { %v549_v30 = vmul.f32 %v2027_v14, %v1978_v47  ;;  %v576_v33 = vsel %vm2017_vm10, %v575_v10, %v571_v20  ;;  %v586_v39 = vsel %vm2054_vm1, %v1965_v35, %v582_v21  ;;  %v536_v41 = vmul.f32 %v1996_v58, %v535_v22  ;;  %vm630_vm4 = vmor %vm628_vm15, %vm629_vm0 }
 0x2c0   :  { %v1475_v19 = vpop.eup %1474  ;;  %v625_v23 = vsub.f32 1.0, %v624_v13  ;;  %v655_v35 = vmul.f32 %v576_v33, %v1870_v49  ;;  %v591_v57 = vsel %vm2022_vm12, %v590_v12, %v586_v39  ;;  %vm2089_vm10 = vmor %vm538_vm8, %vm539_vm2  ;;  %v545_v26 = vor.u32 1.1754944e-38, %v544_v24 }
 0x2c1   :  { %v639_v29 = vmul.f32 %v1475_v19, %v1988_v53  ;;  %v1477_v43 = vpop.eup %1476  ;;  %vm644_vm5 = vweird.f32 %v1475_v19  ;;  %v550_v51 = vsub.f32 1.0, %v549_v30  ;;  %v537_v40 = vadd.f32 %v1996_v58, %v536_v41 }
 0x2c2   :  { %v626_v32 = vmul.f32 %v1471_v6, %v625_v23  ;;  %v2072_v56 = vadd.f32 1.0, %v1477_v43  ;;  %vm645_vm7 = vmor %vm643_vm6, %vm644_vm5  ;;  %v656_v4 = vmul.f32 %v591_v57, %v1872_v50  ;;  %v604_v10 = vand.u32 2147483648, %v2035_v17  ;;  %v1441_v43 = vld [vmem:[%s2148_s10] ss:$0 sm:$0xff] }
 0x2c3   :  { %v640_v31 = vsub.f32 1.0, %v639_v29  ;;  %v551_v1 = vmul.f32 %v2027_v14, %v550_v51  ;;  %v541_v9 = vsel %vm2089_vm10, %v1996_v58, %v537_v40  ;;  %v602_v50 = vand.u32 2147483647, %v2035_v17 }
 0x2c4   :  { %v627_v42 = vadd.f32 %v1471_v6, %v626_v32  ;;  %v1479_v60 = vpop.eup %1478  ;;  %1480 = vrcp.f32 %v2072_v56  ;;  %vm543_vm12 = vcmp.eq.f32.partialorder %v542_v62, 8.507059e+37  ;;  %vm554_vm13 = vweird.f32 %v2027_v14 }
 0x2c5   :  { %v641_v45 = vmul.f32 %v1475_v19, %v640_v31  ;;  %v594_v49 = vmul.f32 %v1479_v60, %v2035_v17  ;;  %vm599_vm11 = vweird.f32 %v1479_v60  ;;  %v552_v15 = vadd.f32 %v2027_v14, %v551_v1 }
 0x2c6   :  { %v631_v52 = vsel %vm630_vm4, %v1471_v6, %v627_v42  ;;  %vm598_vm14 = vweird.f32 %v2035_v17  ;;  %vm553_vm15 = vweird.f32 %v1978_v47  ;;  %v605_v20 = vor.u32 1.1754944e-38, %v604_v10 }
 0x2c7   :  { %v636_v48 = vsel %vm2059_vm3, %v635_v44, %v631_v52  ;;  %v642_v59 = vadd.f32 %v1475_v19, %v641_v45  ;;  %v595_v6 = vsub.f32 1.0, %v594_v49  ;;  %vm600_vm0 = vmor %vm598_vm14, %vm599_vm11  ;;  %v557_v22 = vand.u32 2147483647, %v1978_v47 }
 0x2c8   :  { %v659_v54 = vmul.f32 %v636_v48, %v1910_v7  ;;  %vm2105_vm1 = vmor %vm553_vm15, %vm554_vm13  ;;  %vm603_vm2 = vcmp.eq.f32.partialorder %v602_v50, 8.507059e+37  ;;  %v619_v30 = vand.u32 2147483648, %v2072_v56  ;;  %v617_v34 = vand.u32 2147483647, %v2072_v56 }
 0x2c9   :  { %v646_v53 = vsel %vm645_vm7, %v1475_v19, %v642_v59  ;;  %v596_v12 = vmul.f32 %v1479_v60, %v595_v6  ;;  %v559_v19 = vand.u32 2147483648, %v1978_v47  ;;  %v556_v27 = vsel %vm2105_vm1, %v2027_v14, %v552_v15 }
 0x2ca   :  { %v663_v2 = vpack.c.bf16 %v659_v54, %v655_v35  ;;  %v651_v3 = vsel %vm648_vm9, %v650_v61, %v646_v53  ;;  %v1481_v13 = vpop.eup %1480  ;;  %vm558_vm4 = vcmp.eq.f32.partialorder %v557_v22, 8.507059e+37  ;;  %vm613_vm5 = vweird.f32 %v2072_v56 }
 0x2cb   :  { %v660_v5 = vmul.f32 %v651_v3, %v1912_v8  ;;  %v546_v8 = vsel %vm543_vm12, %v545_v26, %v541_v9  ;;  %v597_v16 = vadd.f32 %v1479_v60, %v596_v12  ;;  %v609_v58 = vmul.f32 %v1481_v13, %v2072_v56 }
 0x2cc   :  { %961 = vmatmul.bf16.vlgmr.msra.gmra.mxu0 %v663_v2  ;;  %v653_v17 = vmul.f32 %v546_v8, %v1896_v63  ;;  %vm614_vm3 = vweird.f32 %v1481_v13  ;;  %v560_v36 = vor.u32 1.1754944e-38, %v559_v19  ;;  %v620_v39 = vor.u32 1.1754944e-38, %v619_v30 }
 0x2cd   :  { %v664_v11 = vpack.c.bf16 %v660_v5, %v656_v4  ;;  %v601_v23 = vsel %vm600_vm0, %v1479_v60, %v597_v16  ;;  %v610_v24 = vsub.f32 1.0, %v609_v58  ;;  %vm615_vm6 = vmor %vm613_vm5, %vm614_vm3  ;;  %vm618_vm7 = vcmp.eq.f32.partialorder %v617_v34, 8.507059e+37 }
 0x2ce   :  { %v606_v29 = vsel %vm603_vm2, %v605_v20, %v601_v23  ;;  %v561_v63 = vsel %vm558_vm4, %v560_v36, %v556_v27  ;;  %v1442_v20 = vld [vmem:[%s2149_s11] ss:$0 sm:$0xff]  ;;  %s1513_s11 = smov [#allocation3]  }
 0x2cf   :  { %975 = vmatmul.bf16.vlgmr.msra.gmra.mxu1 %v664_v11  ;;  %v657_v32 = vmul.f32 %v606_v29, %v1946_v25  ;;  %v611_v33 = vmul.f32 %v1481_v13, %v610_v24  ;;  %v654_v42 = vmul.f32 %v561_v63, %v1900_v0  ;;  %v1443_v23 = vld [vmem:[%s2150_s12] ss:$0 sm:$0xff]  ;;  %s1041_s24 = sshll.u32 %s1513_s11, 4  ;;  %s1514_s12 = smov 128   ;;  %s1042_s24 = int_to_ptr.vmem [resolvable:$true] %s1041_s24 }
 0x2d1   :  { %v612_v47 = vadd.f32 %v1481_v13, %v611_v33  ;;  %v661_v31 = vpack.c.bf16 %v657_v32, %v653_v17 }
 0x2d3   :  { %v616_v41 = vsel %vm615_vm6, %v1481_v13, %v612_v47  ;;  %933 = vmatmul.bf16.vlgmr.msrb.gmra.mxu2 %v661_v31 }
 0x2d4   :  { %v621_v14 = vsel %vm618_vm7, %v620_v39, %v616_v41 }
 0x2d5   :  { %v658_v25 = vmul.f32 %v621_v14, %v1993_v55 }
 0x2d7   :  { %v662_v18 = vpack.c.bf16 %v658_v25, %v654_v42 }
 0x2d9   :  { %947 = vmatmul.bf16.vlgmr.msrb.gmra.mxu3 %v662_v18 }
 0x349   :  { %v962_v46 = vpop.f32.mrf.mxu0 }
 0x34c   :  { %v976_v56 = vpop.f32.mrf.mxu1 }
 0x351   :  { %v964_v40 = vpop.f32.mrf.mxu0 }
 0x354   :  { %v978_v61 = vpop.f32.mrf.mxu1 }
 0x356   :  { %v934_v44 = vpop.f32.mrf.mxu2 }
 0x357   :  { %v935_v45 = vadd.f32 %v1441_v43, %v934_v44 }
 0x35c   :  { %v948_v51 = vpop.f32.mrf.mxu3 }
 0x35d   :  { %v949_v52 = vadd.f32 %v948_v51, %v935_v45 }
 0x35e   :  { %v936_v35 = vpop.f32.mrf.mxu2 }
 0x35f   :  { %v963_v57 = vadd.f32 %v962_v46, %v949_v52  ;;  %v937_v48 = vadd.f32 %v1441_v43, %v936_v35 }
 0x361   :  { %v977_v59 = vadd.f32 %v976_v56, %v963_v57 }
 0x363   :  { %v981_v0 = vadd.f32 %v977_v59, %v1839_v37 }
 0x364   :  { %v950_v60 = vpop.f32.mrf.mxu3 }
 0x365   :  { %v951_v55 = vadd.f32 %v950_v60, %v937_v48  ;;  %983 = vadd.xlane.f32.xlu2 %v981_v0 }
 0x367   :  { %v965_v54 = vadd.f32 %v964_v40, %v951_v55 }
 0x369   :  { %v979_v53 = vadd.f32 %v978_v61, %v965_v54 }
 0x36b   :  { %v982_v49 = vadd.f32 %v979_v53, %v1841_v38 }
 0x36d   :  { %985 = vadd.xlane.f32.xlu2 %v982_v49 }
 0x3d8   :  { %v984_v62 = vpop.xlane.xlu2 %983 }
 0x3d9   :  { %v987_v1 = vmul.f32 %v984_v62, %v1625_v28 }
 0x3db   :  { %v989_v2 = vsub.f32 %v981_v0, %v987_v1 }
 0x3dd   :  { %v991_v3 = vmul.f32 %v989_v2, %v989_v2 }
 0x3df   :  { %993 = vadd.xlane.f32.xlu0 %v991_v3 }
 0x3e0   :  { %v986_v4 = vpop.xlane.xlu2 %985 }
 0x3e1   :  { %v988_v7 = vmul.f32 %v986_v4, %v1625_v28 }
 0x3e3   :  { %v990_v37 = vsub.f32 %v982_v49, %v988_v7 }
 0x3e5   :  { %v992_v5 = vmul.f32 %v990_v37, %v990_v37 }
 0x3e7   :  { %995 = vadd.xlane.f32.xlu1 %v992_v5 }
 0x452   :  { %v994_v6 = vpop.xlane.xlu0 %993 }
 0x453   :  { %v997_v9 = vmul.f32 %v994_v6, %v1625_v28 }
 0x455   :  { %v999_v26 = vadd.f32 1e-05, %v997_v9 }
 0x457   :  { %1482 = vrsqrt.f32 %v999_v26  ;;  %vm1007_vm9 = vweird.f32 %v999_v26 }
 0x45a   :  { %v996_v10 = vpop.xlane.xlu1 %995 }
 0x45b   :  { %v998_v38 = vmul.f32 %v996_v10, %v1625_v28 }
 0x45d   :  { %v1483_v11 = vpop.eup %1482  ;;  %v1000_v12 = vadd.f32 1e-05, %v998_v38 }
 0x45e   :  { %v1002_v50 = vmul.f32 %v1483_v11, %v999_v26  ;;  %vm1008_vm8 = vweird.f32 %v1483_v11 }
 0x45f   :  { %1484 = vrsqrt.f32 %v1000_v12  ;;  %vm1009_vm10 = vmor %vm1007_vm9, %vm1008_vm8  ;;  %vm1017_vm12 = vweird.f32 %v1000_v12 }
 0x460   :  { %v1003_v13 = vmul.f32 %v1483_v11, %v1002_v50 }
 0x462   :  { %v1004_v15 = vmul.f32 0.5, %v1003_v13 }
 0x464   :  { %v1005_v8 = vsub.f32 1.5, %v1004_v15 }
 0x465   :  { %v1485_v16 = vpop.eup %1484 }
 0x466   :  { %v1006_v58 = vmul.f32 %v1483_v11, %v1005_v8  ;;  %v1012_v19 = vmul.f32 %v1485_v16, %v1000_v12  ;;  %vm1018_vm11 = vweird.f32 %v1485_v16 }
 0x467   :  { %vm1019_vm13 = vmor %vm1017_vm12, %vm1018_vm11 }
 0x468   :  { %v1010_v21 = vsel %vm1009_vm10, %v1483_v11, %v1006_v58  ;;  %v1013_v22 = vmul.f32 %v1485_v16, %v1012_v19 }
 0x469   :  { %v1021_v28 = vmul.f32 %v1010_v21, %v989_v2 }
 0x46a   :  { %v1014_v24 = vmul.f32 0.5, %v1013_v22 }
 0x46b   :  { %v1027_v17 = vmul.f32 %v1442_v20, %v1021_v28 }
 0x46c   :  { %v1015_v27 = vsub.f32 1.5, %v1014_v24 }
 0x46d   :  { %v1033_v29 = vadd.f32 %v1443_v23, %v1027_v17 }
 0x46e   :  { %v1016_v30 = vmul.f32 %v1485_v16, %v1015_v27 }
 0x46f   :  { %1035 = vst [vmem:[#allocation3] sm:$0xff] %v1033_v29 }
 0x470   :  { %v1020_v32 = vsel %vm1019_vm13, %v1485_v16, %v1016_v30 }
 0x471   :  { %v1022_v33 = vmul.f32 %v1020_v32, %v990_v37 }
 0x473   :  { %v1028_v34 = vmul.f32 %v1442_v20, %v1022_v33 }
 0x475   :  { %v1034_v36 = vadd.f32 %v1443_v23, %v1028_v34 }
 0x477   :  { %1036 = vst [vmem:[#allocation3 + $0x8] sm:$0xff] %v1034_v36 }
 0x478   :  { %1049 = dma.vmem_to_hbm [thread:$0]  %s1042_s24, 256, %s1044_s27, [#allocation4], %s1514_s12, %s1514_s12, %s1515_s7  }
 0x479   :  { %1510 = dma.done.wait [#allocation4], 256  }
 0x47a   :  { %1511 = vsyncadd [#allocation4], 4294967040 }
 0x47b   :  { %1054 = vsyncpa [#allocation4], 1 }

// kernel: graph_conv_encoder_layer.1
= control target key start
LH: loop header
LB: loop body
LE: loop exit
PB: predicated region body
PF: predicated region fallthrough
CT: control target
= control target key end

     0   :  { %vm69_vm0 = vcmask 130048   ;;  %s2138_s0 = inlined_call_operand.vmem [shape: f32[16,128], index: 0, kind: input, shape index: {}]   ;;  %s2139_s1 = inlined_call_operand.vmem [shape: bf16[16,16], index: 1, kind: input, shape index: {}]   ;;  %s2140_s2 = inlined_call_operand.vmem [shape: bf16[16,128], index: 2, kind: input, shape index: {}]   ;;  %s2141_s3 = inlined_call_operand.vmem [shape: bf16[128,128], index: 3, kind: input, shape index: {}]   ;;  %s2142_s4 = inlined_call_operand.vmem [shape: f32[1,128], index: 4, kind: input, shape index: {}]   ;;  %s2143_s5 = inlined_call_operand.vmem [shape: f32[1,128], index: 5, kind: input, shape index: {}]   ;;  %s2144_s6 = inlined_call_operand.vmem [shape: f32[1,128], index: 6, kind: input, shape index: {}]   ;;  %s2145_s7 = inlined_call_operand.vmem [shape: bf16[128,512], index: 7, kind: input, shape index: {}]   ;;  %s2146_s8 = inlined_call_operand.vmem [shape: f32[1,512], index: 8, kind: input, shape index: {}]   ;;  %s2147_s9 = inlined_call_operand.vmem [shape: bf16[512,128], index: 9, kind: input, shape index: {}]   ;;  %s2148_s10 = inlined_call_operand.vmem [shape: f32[1,128], index: 10, kind: input, shape index: {}]   ;;  %s2149_s11 = inlined_call_operand.vmem [shape: f32[1,128], index: 11, kind: input, shape index: {}]   ;;  %s2150_s12 = inlined_call_operand.vmem [shape: f32[1,128], index: 12, kind: input, shape index: {}]   ;;  %s2151_s13 = inlined_call_operand.hbm [shape: f32[16,128], index: 13, kind: output, shape index: {}]  }
   0x1   :  { %v1361_v0 = vld [vmem:[%s2140_s2] sm:$0xff]  ;;  %v1369_v1 = vld [vmem:[%s2141_s3 + $0x38] sm:$0xff]  ;;  %v1368_v3 = vld [vmem:[%s2141_s3 + $0x30] sm:$0xff] }
   0x2   :  { %v1360_v2 = vld [vmem:[%s2139_s1] sm:$0xff]  ;;  %80 = vmatpush.bf16.msra.mxu0 %v1361_v0  ;;  %165 = vmatpush.bf16.msra.mxu1 %v1369_v1 }
   0x3   :  { %18 = vsyncpa [#allocation4], 0  ;;  %v1367_v4 = vld [vmem:[%s2141_s3 + $0x28] sm:$0xff]  ;;  %v1366_v5 = vld [vmem:[%s2141_s3 + $0x20] sm:$0xff]  ;;  %v1512_v22 = vmov 128.0   ;;  %s1043_s27 = sshll.u32 %s2151_s13, 4  ;;  %s1044_s27 = int_to_ptr.hbm [resolvable:$true] %s1043_s27 }
   0x4   :  { %v1365_v6 = vld [vmem:[%s2141_s3 + $0x18] sm:$0xff]  ;;  %v1364_v7 = vld [vmem:[%s2141_s3 + $0x10] sm:$0xff]  ;;  %v1363_v8 = vld [vmem:[%s2141_s3 + $0x8] sm:$0xff]  ;;  %1444 = vrcp.f32 %v1512_v22 }
   0x5   :  { %1063 = vmatmul.msk.bf16.vlgmr.msra.gmra.mxu0 %vm69_vm0, %v1360_v2  ;;  %v1362_v9 = vld [vmem:[%s2141_s3] sm:$0xff]  ;;  %v180_v19 = vld [vmem:[%s2138_s0 + $0x8] sm:$0xff]  ;;  %v1400_v38 = vld [vmem:[%s2145_s7 + $0xec] sm:$0xf0] }
   0x6   :  { %166 = vmatpush.bf16.msra.mxu1 %v1368_v3  ;;  %v1438_v13 = vld [vmem:[%s2142_s4] ss:$0 sm:$0xff]  ;;  %v1398_v39 = vld [vmem:[%s2145_s7 + $0xe4] sm:$0xf]  ;;  %v1212_v41 = vld [vmem:[%s2145_s7 + $0xf0] sm:$0xf0] }
   0x7   :  { %v179_v15 = vld [vmem:[%s2138_s0] sm:$0xff]  ;;  %v1218_v42 = vld [vmem:[%s2145_s7 + $0xe8] sm:$0xf]  ;;  %v1401_v43 = vld [vmem:[%s2145_s7 + $0xf4] sm:$0xf0]  ;;  %v1215_v44 = vor.u32 %v1398_v39, %v1212_v41 }
   0x8   :  { %v1210_v37 = vld [vmem:[%s2145_s7 + $0xe0] sm:$0xf]  ;;  %v1219_v45 = vor.u32 %v1401_v43, %v1218_v42  ;;  %v1399_v46 = vld [vmem:[%s2145_s7 + $0xec] sm:$0xf]  ;;  %v1220_v47 = vld [vmem:[%s2145_s7 + $0xf8] sm:$0xf0] }
   0x9   :  { %v1211_v40 = vor.u32 %v1400_v38, %v1210_v37  ;;  %v1223_v48 = vor.u32 %v1399_v46, %v1220_v47  ;;  %459 = vmatpush.bf16.msra.mxu3 %v1215_v44  ;;  %v1194_v49 = vld [vmem:[%s2145_s7 + $0xc0] sm:$0xf]  ;;  %v1396_v50 = vld [vmem:[%s2145_s7 + $0xcc] sm:$0xf0]  ;;  %v1394_v51 = vld [vmem:[%s2145_s7 + $0xc4] sm:$0xf] }
   0xa   :  { %167 = vmatpush.bf16.msra.mxu1 %v1367_v4  ;;  %v1445_v23 = vpop.eup %1444  ;;  %473 = vmatpush.bf16.msrb.mxu0 %v1219_v45  ;;  %v1195_v52 = vor.u32 %v1396_v50, %v1194_v49  ;;  %v1196_v53 = vld [vmem:[%s2145_s7 + $0xd0] sm:$0xf0]  ;;  %v1202_v54 = vld [vmem:[%s2145_s7 + $0xc8] sm:$0xf]  ;;  %v1397_v55 = vld [vmem:[%s2145_s7 + $0xd4] sm:$0xf0] }
   0xb   :  { %v188_v24 = vmul.f32 128.0, %v1445_v23  ;;  %vm192_vm1 = vweird.f32 %v1445_v23  ;;  %445 = vmatpush.bf16.msra.mxu2 %v1211_v40  ;;  %v1199_v56 = vor.u32 %v1394_v51, %v1196_v53  ;;  %v1203_v57 = vor.u32 %v1397_v55, %v1202_v54  ;;  %v1395_v58 = vld [vmem:[%s2145_s7 + $0xcc] sm:$0xf]  ;;  %v1204_v59 = vld [vmem:[%s2145_s7 + $0xd8] sm:$0xf0] }
   0xc   :  { %v1207_v60 = vor.u32 %v1395_v58, %v1204_v59  ;;  %v1178_v61 = vld [vmem:[%s2145_s7 + $0xa0] sm:$0xf]  ;;  %v1392_v62 = vld [vmem:[%s2145_s7 + $0xac] sm:$0xf0]  ;;  %v1390_v63 = vld [vmem:[%s2145_s7 + $0xa4] sm:$0xf] }
   0xd   :  { %v189_v25 = vsub.f32 1.0, %v188_v24  ;;  %460 = vmatpush.bf16.msra.mxu3 %v1199_v56  ;;  %v1179_v0 = vor.u32 %v1392_v62, %v1178_v61  ;;  %v1180_v1 = vld [vmem:[%s2145_s7 + $0xb0] sm:$0xf0]  ;;  %v1186_v2 = vld [vmem:[%s2145_s7 + $0xa8] sm:$0xf] }
   0xe   :  { %168 = vmatpush.bf16.msra.mxu1 %v1366_v5  ;;  %474 = vmatpush.bf16.msrb.mxu0 %v1203_v57  ;;  %v1393_v3 = vld [vmem:[%s2145_s7 + $0xb4] sm:$0xf0]  ;;  %v1183_v4 = vor.u32 %v1390_v63, %v1180_v1  ;;  %v1384_v22 = vld [vmem:[%s2145_s7 + $0x6c] sm:$0xf0]  ;;  %v1378_v38 = vld [vmem:[%s2145_s7 + $0x44] sm:$0xf] }
   0xf   :  { %v190_v26 = vmul.f32 %v1445_v23, %v189_v25  ;;  %446 = vmatpush.bf16.msra.mxu2 %v1195_v52  ;;  %v1187_v5 = vor.u32 %v1393_v3, %v1186_v2  ;;  %v1148_v25 = vld [vmem:[%s2145_s7 + $0x70] sm:$0xf0]  ;;  %v1380_v37 = vld [vmem:[%s2145_s7 + $0x4c] sm:$0xf0]  ;;  %v1138_v41 = vld [vmem:[%s2145_s7 + $0x48] sm:$0xf] }
  0x10   :  { %v1132_v40 = vld [vmem:[%s2145_s7 + $0x50] sm:$0xf0]  ;;  %v1381_v42 = vld [vmem:[%s2145_s7 + $0x54] sm:$0xf0]  ;;  %v1379_v45 = vld [vmem:[%s2145_s7 + $0x4c] sm:$0xf] }
  0x11   :  { %v191_v27 = vadd.f32 %v1445_v23, %v190_v26  ;;  %461 = vmatpush.bf16.msra.mxu3 %v1183_v4  ;;  %v1154_v26 = vld [vmem:[%s2145_s7 + $0x68] sm:$0xf]  ;;  %v1135_v43 = vor.u32 %v1378_v38, %v1132_v40  ;;  %v1139_v44 = vor.u32 %v1381_v42, %v1138_v41  ;;  %v1140_v46 = vld [vmem:[%s2145_s7 + $0x58] sm:$0xf0]  ;;  %v1376_v49 = vld [vmem:[%s2145_s7 + $0x2c] sm:$0xf0] }
  0x12   :  { %169 = vmatpush.bf16.msra.mxu1 %v1365_v6  ;;  %v1391_v6 = vld [vmem:[%s2145_s7 + $0xac] sm:$0xf]  ;;  %475 = vmatpush.bf16.msrb.mxu0 %v1187_v5  ;;  %v1143_v47 = vor.u32 %v1379_v45, %v1140_v46  ;;  %v1374_v50 = vld [vmem:[%s2145_s7 + $0x24] sm:$0xf]  ;;  %v1116_v52 = vld [vmem:[%s2145_s7 + $0x30] sm:$0xf0] }
  0x13   :  { %v1625_v28 = vsel %vm192_vm1, %v1445_v23, %v191_v27  ;;  %447 = vmatpush.bf16.msra.mxu2 %v1179_v0  ;;  %v1382_v23 = vld [vmem:[%s2145_s7 + $0x64] sm:$0xf]  ;;  %v1385_v27 = vld [vmem:[%s2145_s7 + $0x74] sm:$0xf0]  ;;  %v1122_v53 = vld [vmem:[%s2145_s7 + $0x28] sm:$0xf]  ;;  %v1119_v55 = vor.u32 %v1374_v50, %v1116_v52 }
  0x14   :  { %v1377_v54 = vld [vmem:[%s2145_s7 + $0x34] sm:$0xf0]  ;;  %v1375_v57 = vld [vmem:[%s2145_s7 + $0x2c] sm:$0xf]  ;;  %v1124_v58 = vld [vmem:[%s2145_s7 + $0x38] sm:$0xf0] }
  0x15   :  { %v1123_v56 = vor.u32 %v1377_v54, %v1122_v53  ;;  %v1098_v59 = vld [vmem:[%s2145_s7] sm:$0xf]  ;;  %v1127_v61 = vor.u32 %v1375_v57, %v1124_v58  ;;  %v1372_v62 = vld [vmem:[%s2145_s7 + $0xc] sm:$0xf0]  ;;  %v1370_v63 = vld [vmem:[%s2145_s7 + $0x4] sm:$0xf] }
  0x16   :  { %170 = vmatpush.bf16.msra.mxu1 %v1364_v7  ;;  %v1188_v7 = vld [vmem:[%s2145_s7 + $0xb8] sm:$0xf0]  ;;  %v1100_v0 = vld [vmem:[%s2145_s7 + $0x10] sm:$0xf0]  ;;  %v1099_v2 = vor.u32 %v1372_v62, %v1098_v59  ;;  %v1106_v4 = vld [vmem:[%s2145_s7 + $0x8] sm:$0xf] }
  0x17   :  { %v1103_v3 = vor.u32 %v1370_v63, %v1100_v0  ;;  %v1373_v5 = vld [vmem:[%s2145_s7 + $0x14] sm:$0xf0]  ;;  %v1854_v40 = vld [vmem:[%s2146_s8] sm:$0xf]  ;;  %v1431_v52 = vld [vmem:[%s2147_s9 + $0xe8] sm:$0xff] }
  0x18   :  { %v279_v41 = vperm.slane %v1854_v40, 2  ;;  %v280_v42 = vperm.slane %v1854_v40, 3  ;;  %v1409_v45 = vld [vmem:[%s2147_s9 + $0x38] sm:$0xff]  ;;  %v277_v53 = vperm.slane %v1854_v40, 0  ;;  %v278_v54 = vperm.slane %v1854_v40, 1  ;;  %v1408_v57 = vld [vmem:[%s2147_s9 + $0x30] sm:$0xff] }
  0x19   :  { %v1417_v46 = vld [vmem:[%s2147_s9 + $0x78] sm:$0xff]  ;;  %v1416_v58 = vld [vmem:[%s2147_s9 + $0x70] sm:$0xff]  ;;  %v1430_v62 = vld [vmem:[%s2147_s9 + $0xe0] sm:$0xff] }
  0x1a   :  { %171 = vmatpush.bf16.msra.mxu1 %v1363_v8  ;;  %v1191_v8 = vor.u32 %v1391_v6, %v1188_v7  ;;  %v1371_v6 = vld [vmem:[%s2145_s7 + $0xc] sm:$0xf]  ;;  %v1107_v7 = vor.u32 %v1373_v5, %v1106_v4  ;;  %v1410_v40 = vld [vmem:[%s2147_s9 + $0x40] sm:$0xff] }
  0x1e   :  { %172 = vmatpush.bf16.msra.mxu1 %v1362_v9  ;;  %v1162_v9 = vld [vmem:[%s2145_s7 + $0x80] sm:$0xf] }
  0x22   :  { %487 = vmatpush.bf16.msrb.mxu1 %v1223_v48  ;;  %v1114_v48 = vld [vmem:[%s2145_s7 + $0x20] sm:$0xf] }
  0x23   :  { %v1115_v51 = vor.u32 %v1376_v49, %v1114_v48 }
  0x26   :  { %488 = vmatpush.bf16.msrb.mxu1 %v1207_v60 }
  0x2a   :  { %489 = vmatpush.bf16.msrb.mxu1 %v1191_v8  ;;  %v1108_v8 = vld [vmem:[%s2145_s7 + $0x18] sm:$0xf0] }
  0x82   :  { %v82_v10 = vpop.f32.mrf.mxu0 }
  0x8a   :  { %v84_v11 = vpop.f32.mrf.mxu0 }
  0x8b   :  { %v96_v12 = vpack.c.bf16 %v84_v11, %v82_v10  ;;  %v1388_v10 = vld [vmem:[%s2145_s7 + $0x8c] sm:$0xf0]  ;;  %v1386_v11 = vld [vmem:[%s2145_s7 + $0x84] sm:$0xf] }
  0x8d   :  { %173 = vmatmul.bf16.vlgmr.msra.gmra.mxu1 %v96_v12  ;;  %v1163_v12 = vor.u32 %v1388_v10, %v1162_v9  ;;  %v1111_v10 = vor.u32 %v1371_v6, %v1108_v8 }
  0x8f   :  { %448 = vmatpush.bf16.msra.mxu2 %v1163_v12 }
 0x10a   :  { %v174_v14 = vpop.f32.mrf.mxu1 }
 0x10b   :  { %v175_v16 = vadd.f32 %v1438_v13, %v174_v14  ;;  %v1170_v14 = vld [vmem:[%s2145_s7 + $0x88] sm:$0xf] }
 0x10d   :  { %v181_v17 = vadd.f32 %v179_v15, %v175_v16  ;;  %v1389_v15 = vld [vmem:[%s2145_s7 + $0x94] sm:$0xf0] }
 0x10f   :  { %183 = vadd.xlane.f32.xlu0 %v181_v17 }
 0x112   :  { %v176_v18 = vpop.f32.mrf.mxu1 }
 0x113   :  { %v177_v20 = vadd.f32 %v1438_v13, %v176_v18  ;;  %v1164_v13 = vld [vmem:[%s2145_s7 + $0x90] sm:$0xf0]  ;;  %v1387_v18 = vld [vmem:[%s2145_s7 + $0x8c] sm:$0xf] }
 0x114   :  { %v1167_v16 = vor.u32 %v1386_v11, %v1164_v13 }
 0x115   :  { %v182_v21 = vadd.f32 %v180_v19, %v177_v20  ;;  %v1172_v19 = vld [vmem:[%s2145_s7 + $0x98] sm:$0xf0] }
 0x116   :  { %v1175_v20 = vor.u32 %v1387_v18, %v1172_v19  ;;  %462 = vmatpush.bf16.msra.mxu3 %v1167_v16 }
 0x117   :  { %185 = vadd.xlane.f32.xlu0 %v182_v21 }
 0x118   :  { %490 = vmatpush.bf16.msrb.mxu1 %v1175_v20 }
 0x182   :  { %v184_v29 = vpop.xlane.xlu0 %183 }
 0x183   :  { %v194_v30 = vmul.f32 %v1625_v28, %v184_v29  ;;  %v1151_v29 = vor.u32 %v1382_v23, %v1148_v25 }
 0x185   :  { %v1628_v31 = vsub.f32 %v181_v17, %v194_v30  ;;  %v1171_v17 = vor.u32 %v1389_v15, %v1170_v14  ;;  %v1155_v30 = vor.u32 %v1385_v27, %v1154_v26  ;;  %463 = vmatpush.bf16.msra.mxu3 %v1151_v29  ;;  %v1439_v27 = vld [vmem:[%s2143_s5] ss:$0 sm:$0xff] }
 0x187   :  { %v198_v32 = vmul.f32 %v1628_v31, %v1628_v31  ;;  %476 = vmatpush.bf16.msrb.mxu0 %v1171_v17 }
 0x189   :  { %200 = vadd.xlane.f32.xlu1 %v198_v32  ;;  %v1383_v32 = vld [vmem:[%s2145_s7 + $0x6c] sm:$0xf]  ;;  %464 = vmatpush.bf16.msra.mxu3 %v1135_v43  ;;  %v1424_v43 = vld [vmem:[%s2147_s9 + $0xb0] sm:$0xff] }
 0x18a   :  { %v186_v33 = vpop.xlane.xlu0 %185 }
 0x18b   :  { %v195_v34 = vmul.f32 %v1625_v28, %v186_v33  ;;  %v1156_v33 = vld [vmem:[%s2145_s7 + $0x78] sm:$0xf0]  ;;  %477 = vmatpush.bf16.msrb.mxu0 %v1155_v30 }
 0x18d   :  { %v1633_v35 = vsub.f32 %v182_v21, %v195_v34  ;;  %v1146_v21 = vld [vmem:[%s2145_s7 + $0x60] sm:$0xf]  ;;  %v1159_v34 = vor.u32 %v1383_v32, %v1156_v33  ;;  %465 = vmatpush.bf16.msra.mxu3 %v1119_v55 }
 0x18e   :  { %v1147_v24 = vor.u32 %v1384_v22, %v1146_v21 }
 0x18f   :  { %v199_v36 = vmul.f32 %v1633_v35, %v1633_v35  ;;  %491 = vmatpush.bf16.msrb.mxu1 %v1159_v34  ;;  %478 = vmatpush.bf16.msrb.mxu0 %v1139_v44  ;;  %v1440_v34 = vld [vmem:[%s2144_s6] ss:$0 sm:$0xff]  ;;  %v1432_v44 = vld [vmem:[%s2147_s9 + $0xf0] sm:$0xff] }
 0x190   :  { %449 = vmatpush.bf16.msra.mxu2 %v1147_v24 }
 0x191   :  { %202 = vadd.xlane.f32.xlu1 %v199_v36  ;;  %v1130_v36 = vld [vmem:[%s2145_s7 + $0x40] sm:$0xf]  ;;  %466 = vmatpush.bf16.msra.mxu3 %v1103_v3  ;;  %s1515_s7 = smov 8  }
 0x192   :  { %v1131_v39 = vor.u32 %v1380_v37, %v1130_v36 }
 0x193   :  { %492 = vmatpush.bf16.msrb.mxu1 %v1143_v47  ;;  %479 = vmatpush.bf16.msrb.mxu0 %v1123_v56 }
 0x194   :  { %450 = vmatpush.bf16.msra.mxu2 %v1131_v39  ;;  %v1433_v39 = vld [vmem:[%s2147_s9 + $0xf8] sm:$0xff] }
 0x195   :  { %939 = vmatpush.bf16.msrb.mxu3 %v1417_v46 }
 0x197   :  { %493 = vmatpush.bf16.msrb.mxu1 %v1127_v61  ;;  %480 = vmatpush.bf16.msrb.mxu0 %v1107_v7  ;;  %v1422_v61 = vld [vmem:[%s2147_s9 + $0xa0] sm:$0xff] }
 0x198   :  { %451 = vmatpush.bf16.msra.mxu2 %v1115_v51  ;;  %v1423_v51 = vld [vmem:[%s2147_s9 + $0xa8] sm:$0xff] }
 0x199   :  { %940 = vmatpush.bf16.msrb.mxu3 %v1416_v58 }
 0x19b   :  { %494 = vmatpush.bf16.msrb.mxu1 %v1111_v10  ;;  %v1429_v10 = vld [vmem:[%s2147_s9 + $0xd8] sm:$0xff] }
 0x19c   :  { %452 = vmatpush.bf16.msra.mxu2 %v1099_v2  ;;  %v1415_v2 = vld [vmem:[%s2147_s9 + $0x68] sm:$0xff] }
 0x19d   :  { %941 = vmatpush.bf16.msrb.mxu3 %v1415_v2 }
 0x19f   :  { %967 = vmatpush.bf16.msra.mxu1 %v1433_v39 }
 0x1a0   :  { %925 = vmatpush.bf16.msrb.mxu2 %v1409_v45 }
 0x1a3   :  { %968 = vmatpush.bf16.msra.mxu1 %v1432_v44 }
 0x1a4   :  { %926 = vmatpush.bf16.msrb.mxu2 %v1408_v57 }
 0x1a7   :  { %969 = vmatpush.bf16.msra.mxu1 %v1431_v52  ;;  %v1411_v52 = vld [vmem:[%s2147_s9 + $0x48] sm:$0xff] }
 0x1ab   :  { %970 = vmatpush.bf16.msra.mxu1 %v1430_v62 }
 0x1af   :  { %971 = vmatpush.bf16.msra.mxu1 %v1429_v10 }
 0x1fc   :  { %v201_v60 = vpop.xlane.xlu1 %200 }
 0x1fd   :  { %v204_v1 = vmul.f32 %v201_v60, %v1625_v28 }
 0x1ff   :  { %v206_v9 = vadd.f32 1e-05, %v204_v1  ;;  %v1407_v1 = vld [vmem:[%s2147_s9 + $0x28] sm:$0xff] }
 0x200   :  { %927 = vmatpush.bf16.msrb.mxu2 %v1407_v1 }
 0x201   :  { %1446 = vrsqrt.f32 %v206_v9  ;;  %vm214_vm3 = vweird.f32 %v206_v9 }
 0x204   :  { %v203_v11 = vpop.xlane.xlu1 %202 }
 0x205   :  { %v205_v12 = vmul.f32 %v203_v11, %v1625_v28 }
 0x207   :  { %v1447_v13 = vpop.eup %1446  ;;  %v207_v14 = vadd.f32 1e-05, %v205_v12 }
 0x208   :  { %v209_v15 = vmul.f32 %v1447_v13, %v206_v9  ;;  %vm215_vm2 = vweird.f32 %v1447_v13  ;;  %v1421_v9 = vld [vmem:[%s2147_s9 + $0x98] sm:$0xff] }
 0x209   :  { %1448 = vrsqrt.f32 %v207_v14  ;;  %vm216_vm4 = vmor %vm214_vm3, %vm215_vm2  ;;  %vm224_vm6 = vweird.f32 %v207_v14 }
 0x20a   :  { %v210_v16 = vmul.f32 %v1447_v13, %v209_v15 }
 0x20c   :  { %v211_v17 = vmul.f32 0.5, %v210_v16 }
 0x20e   :  { %v212_v18 = vsub.f32 1.5, %v211_v17 }
 0x20f   :  { %v1449_v19 = vpop.eup %1448 }
 0x210   :  { %v213_v20 = vmul.f32 %v1447_v13, %v212_v18  ;;  %v219_v21 = vmul.f32 %v1449_v19, %v207_v14  ;;  %vm225_vm5 = vweird.f32 %v1449_v19  ;;  %v1414_v14 = vld [vmem:[%s2147_s9 + $0x60] sm:$0xff] }
 0x211   :  { %vm226_vm7 = vmor %vm224_vm6, %vm225_vm5  ;;  %942 = vmatpush.bf16.msrb.mxu3 %v1414_v14 }
 0x212   :  { %v220_v22 = vmul.f32 %v1449_v19, %v219_v21  ;;  %v217_v23 = vsel %vm216_vm4, %v1447_v13, %v213_v20  ;;  %v1406_v13 = vld [vmem:[%s2147_s9 + $0x20] sm:$0xff]  ;;  %v1420_v20 = vld [vmem:[%s2147_s9 + $0x90] sm:$0xff] }
 0x213   :  { %v228_v26 = vmul.f32 %v217_v23, %v1628_v31  ;;  %928 = vmatpush.bf16.msrb.mxu2 %v1406_v13  ;;  %v1428_v21 = vld [vmem:[%s2147_s9 + $0xd0] sm:$0xff]  ;;  %v1413_v23 = vld [vmem:[%s2147_s9 + $0x58] sm:$0xff] }
 0x214   :  { %v221_v24 = vmul.f32 0.5, %v220_v22  ;;  %972 = vmatpush.bf16.msra.mxu1 %v1428_v21  ;;  %v1405_v22 = vld [vmem:[%s2147_s9 + $0x18] sm:$0xff] }
 0x215   :  { %v234_v33 = vmul.f32 %v1439_v27, %v228_v26  ;;  %943 = vmatpush.bf16.msrb.mxu3 %v1413_v23 }
 0x216   :  { %v222_v25 = vsub.f32 1.5, %v221_v24 }
 0x217   :  { %v1839_v37 = vadd.f32 %v1440_v34, %v234_v33  ;;  %929 = vmatpush.bf16.msrb.mxu2 %v1405_v22  ;;  %v1404_v33 = vld [vmem:[%s2147_s9 + $0x10] sm:$0xff] }
 0x218   :  { %v223_v29 = vmul.f32 %v1449_v19, %v222_v25 }
 0x21a   :  { %v227_v30 = vsel %vm226_vm7, %v1449_v19, %v223_v29  ;;  %v1427_v29 = vld [vmem:[%s2147_s9 + $0xc8] sm:$0xff] }
 0x21b   :  { %v229_v32 = vmul.f32 %v227_v30, %v1633_v35  ;;  %v1425_v35 = vld [vmem:[%s2147_s9 + $0xb8] sm:$0xff]  ;;  %973 = vmatpush.bf16.msra.mxu1 %v1427_v29  ;;  %930 = vmatpush.bf16.msrb.mxu2 %v1404_v33 }
 0x21c   :  { %953 = vmatpush.bf16.msra.mxu0 %v1425_v35 }
 0x21d   :  { %v235_v36 = vmul.f32 %v1439_v27, %v229_v32  ;;  %v1419_v27 = vld [vmem:[%s2147_s9 + $0x88] sm:$0xff] }
 0x21f   :  { %v1841_v38 = vadd.f32 %v1440_v34, %v235_v36  ;;  %v1412_v34 = vld [vmem:[%s2147_s9 + $0x50] sm:$0xff] }
 0x220   :  { %954 = vmatpush.bf16.msra.mxu0 %v1424_v43  ;;  %944 = vmatpush.bf16.msrb.mxu3 %v1412_v34 }
 0x221   :  { %v242_v31 = vpack.c.bf16 %v1841_v38, %v1839_v37 }
 0x223   :  { %453 = vmatmul.bf16.vlgmr.msra.gmra.mxu2 %v242_v31  ;;  %467 = vmatmul.bf16.vlgmr.msra.gmra.mxu3 %v242_v31 }
 0x224   :  { %481 = vmatmul.bf16.vlgmr.msrb.gmra.mxu0 %v242_v31  ;;  %495 = vmatmul.bf16.vlgmr.msrb.gmra.mxu1 %v242_v31 }
 0x225   :  { %955 = vmatpush.bf16.msra.mxu0 %v1423_v51  ;;  %v1403_v51 = vld [vmem:[%s2147_s9 + $0x8] sm:$0xff]  ;;  %945 = vmatpush.bf16.msrb.mxu3 %v1411_v52 }
 0x226   :  { %931 = vmatpush.bf16.msrb.mxu2 %v1403_v51 }
 0x229   :  { %956 = vmatpush.bf16.msra.mxu0 %v1422_v61  ;;  %946 = vmatpush.bf16.msrb.mxu3 %v1410_v40 }
 0x22d   :  { %957 = vmatpush.bf16.msra.mxu0 %v1421_v9 }
 0x231   :  { %958 = vmatpush.bf16.msra.mxu0 %v1420_v20 }
 0x235   :  { %959 = vmatpush.bf16.msra.mxu0 %v1419_v27 }
 0x2a1   :  { %v482_v47 = vpop.f32.mrf.mxu0  ;;  %v496_v48 = vpop.f32.mrf.mxu1 }
 0x2a2   :  { %v1870_v49 = vadd.f32 %v482_v47, %v279_v41  ;;  %v1872_v50 = vadd.f32 %v496_v48, %v280_v42 }
 0x2a4   :  { %v1226_v55 = vmul.f32 -1.442695, %v1870_v49  ;;  %v1227_v56 = vmul.f32 -1.442695, %v1872_v50 }
 0x2a6   :  { %1450 = vpow2.f32 %v1226_v55  ;;  %v454_v59 = vpop.f32.mrf.mxu2  ;;  %v468_v60 = vpop.f32.mrf.mxu3 }
 0x2a7   :  { %1452 = vpow2.f32 %v1227_v56  ;;  %v1896_v63 = vadd.f32 %v454_v59, %v277_v53  ;;  %v1900_v0 = vadd.f32 %v468_v60, %v278_v54  ;;  %v1402_v60 = vld [vmem:[%s2147_s9] sm:$0xff] }
 0x2a8   :  { %932 = vmatpush.bf16.msrb.mxu2 %v1402_v60 }
 0x2a9   :  { %v1224_v3 = vmul.f32 -1.442695, %v1896_v63  ;;  %v1225_v4 = vmul.f32 -1.442695, %v1900_v0  ;;  %v484_v5 = vpop.f32.mrf.mxu0  ;;  %v498_v6 = vpop.f32.mrf.mxu1 }
 0x2aa   :  { %v1910_v7 = vadd.f32 %v484_v5, %v279_v41  ;;  %v1912_v8 = vadd.f32 %v498_v6, %v280_v42  ;;  %v1418_v41 = vld [vmem:[%s2147_s9 + $0x80] sm:$0xff] }
 0x2ab   :  { %1454 = vpow2.f32 %v1224_v3  ;;  %v1426_v42 = vld [vmem:[%s2147_s9 + $0xc0] sm:$0xff]  ;;  %960 = vmatpush.bf16.msra.mxu0 %v1418_v41 }
 0x2ac   :  { %v1451_v11 = vpop.eup %1450  ;;  %v1230_v12 = vmul.f32 -1.442695, %v1910_v7  ;;  %1456 = vpow2.f32 %v1225_v4  ;;  %v1231_v17 = vmul.f32 -1.442695, %v1912_v8  ;;  %974 = vmatpush.bf16.msra.mxu1 %v1426_v42 }
 0x2ad   :  { %v1453_v15 = vpop.eup %1452  ;;  %v1927_v16 = vadd.f32 1.0, %v1451_v11 }
 0x2ae   :  { %v1930_v18 = vadd.f32 1.0, %v1453_v15  ;;  %1458 = vpow2.f32 %v1230_v12  ;;  %v456_v19 = vpop.f32.mrf.mxu2  ;;  %v470_v45 = vpop.f32.mrf.mxu3 }
 0x2af   :  { %1460 = vrcp.f32 %v1927_v16  ;;  %v1946_v25 = vadd.f32 %v456_v19, %v277_v53  ;;  %v1993_v55 = vadd.f32 %v470_v45, %v278_v54  ;;  %v572_v59 = vand.u32 2147483647, %v1927_v16 }
 0x2b0   :  { %1462 = vrcp.f32 %v1930_v18  ;;  %v574_v54 = vand.u32 2147483648, %v1927_v16  ;;  %v587_v61 = vand.u32 2147483647, %v1930_v18  ;;  %v589_v62 = vand.u32 2147483648, %v1930_v18 }
 0x2b1   :  { %v1455_v24 = vpop.eup %1454  ;;  %1464 = vpow2.f32 %v1231_v17  ;;  %v1228_v31 = vmul.f32 -1.442695, %v1946_v25  ;;  %v1229_v1 = vmul.f32 -1.442695, %v1993_v55  ;;  %vm568_vm9 = vweird.f32 %v1927_v16 }
 0x2b2   :  { %v1948_v26 = vadd.f32 1.0, %v1455_v24  ;;  %v1457_v30 = vpop.eup %1456  ;;  %vm2017_vm10 = vcmp.eq.f32.partialorder %v572_v59, 8.507059e+37  ;;  %vm583_vm11 = vweird.f32 %v1930_v18  ;;  %v575_v10 = vor.u32 1.1754944e-38, %v574_v54 }
 0x2b3   :  { %v1978_v47 = vadd.f32 1.0, %v1457_v30  ;;  %vm2022_vm12 = vcmp.eq.f32.partialorder %v587_v61, 8.507059e+37  ;;  %v590_v12 = vor.u32 1.1754944e-38, %v589_v62 }
 0x2b4   :  { %v1459_v32 = vpop.eup %1458  ;;  %1466 = vrcp.f32 %v1948_v26  ;;  %v544_v24 = vand.u32 2147483648, %v1948_v26  ;;  %v542_v62 = vand.u32 2147483647, %v1948_v26 }
 0x2b5   :  { %v1962_v36 = vpop.eup %1460  ;;  %v1980_v48 = vadd.f32 1.0, %v1459_v32  ;;  %1468 = vpow2.f32 %v1228_v31 }
 0x2b6   :  { %v1965_v35 = vpop.eup %1462  ;;  %v564_v39 = vmul.f32 %v1962_v36, %v1927_v16  ;;  %vm569_vm8 = vweird.f32 %v1962_v36 }
 0x2b7   :  { %v1465_v43 = vpop.eup %1464  ;;  %v579_v44 = vmul.f32 %v1965_v35, %v1930_v18  ;;  %1470 = vrcp.f32 %v1980_v48  ;;  %vm2029_vm13 = vmor %vm568_vm9, %vm569_vm8  ;;  %vm584_vm14 = vweird.f32 %v1965_v35  ;;  %v632_v16 = vand.u32 2147483647, %v1980_v48 }
 0x2b8   :  { %v565_v46 = vsub.f32 1.0, %v564_v39  ;;  %v1988_v53 = vadd.f32 1.0, %v1465_v43  ;;  %1472 = vrcp.f32 %v1978_v47  ;;  %vm628_vm15 = vweird.f32 %v1980_v48  ;;  %vm2054_vm1 = vmor %vm583_vm11, %vm584_vm14 }
 0x2b9   :  { %v580_v57 = vsub.f32 1.0, %v579_v44  ;;  %v634_v27 = vand.u32 2147483648, %v1980_v48  ;;  %vm2059_vm3 = vcmp.eq.f32.partialorder %v632_v16, 8.507059e+37  ;;  %vm538_vm8 = vweird.f32 %v1948_v26 }
 0x2ba   :  { %v566_v56 = vmul.f32 %v1962_v36, %v565_v46  ;;  %v1996_v58 = vpop.eup %1466  ;;  %1474 = vrcp.f32 %v1988_v53  ;;  %v649_v18 = vand.u32 2147483648, %v1988_v53  ;;  %v647_v46 = vand.u32 2147483647, %v1988_v53 }
 0x2bb   :  { %v1469_v2 = vpop.eup %1468  ;;  %v581_v4 = vmul.f32 %v1965_v35, %v580_v57  ;;  %v534_v5 = vmul.f32 %v1996_v58, %v1948_v26  ;;  %1476 = vpow2.f32 %v1229_v1  ;;  %vm539_vm2 = vweird.f32 %v1996_v58 }
 0x2bc   :  { %v567_v3 = vadd.f32 %v1962_v36, %v566_v56  ;;  %v2035_v17 = vadd.f32 1.0, %v1469_v2  ;;  %v635_v44 = vor.u32 1.1754944e-38, %v634_v27  ;;  %vm643_vm6 = vweird.f32 %v1988_v53 }
 0x2bd   :  { %v1471_v6 = vpop.eup %1470  ;;  %v582_v21 = vadd.f32 %v1965_v35, %v581_v4  ;;  %v535_v22 = vsub.f32 1.0, %v534_v5  ;;  %v650_v61 = vor.u32 1.1754944e-38, %v649_v18  ;;  %vm648_vm9 = vcmp.eq.f32.partialorder %v647_v46, 8.507059e+37 }
 0x2be   :  { %v624_v13 = vmul.f32 %v1471_v6, %v1980_v48  ;;  %v2027_v14 = vpop.eup %1472  ;;  %v571_v20 = vsel %vm2029_vm13, %v1962_v36, %v567_v3  ;;  %vm629_vm0 = vweird.f32 %v1471_v6  ;;  %1478 = vrcp.f32 %v2035_v17 }
 0x2bf   :  { %v549_v30 = vmul.f32 %v2027_v14, %v1978_v47  ;;  %v576_v33 = vsel %vm2017_vm10, %v575_v10, %v571_v20  ;;  %v586_v39 = vsel %vm2054_vm1, %v1965_v35, %v582_v21  ;;  %v536_v41 = vmul.f32 %v1996_v58, %v535_v22  ;;  %vm630_vm4 = vmor %vm628_vm15, %vm629_vm0 }
 0x2c0   :  { %v1475_v19 = vpop.eup %1474  ;;  %v625_v23 = vsub.f32 1.0, %v624_v13  ;;  %v655_v35 = vmul.f32 %v576_v33, %v1870_v49  ;;  %v591_v57 = vsel %vm2022_vm12, %v590_v12, %v586_v39  ;;  %vm2089_vm10 = vmor %vm538_vm8, %vm539_vm2  ;;  %v545_v26 = vor.u32 1.1754944e-38, %v544_v24 }
 0x2c1   :  { %v639_v29 = vmul.f32 %v1475_v19, %v1988_v53  ;;  %v1477_v43 = vpop.eup %1476  ;;  %vm644_vm5 = vweird.f32 %v1475_v19  ;;  %v550_v51 = vsub.f32 1.0, %v549_v30  ;;  %v537_v40 = vadd.f32 %v1996_v58, %v536_v41 }
 0x2c2   :  { %v626_v32 = vmul.f32 %v1471_v6, %v625_v23  ;;  %v2072_v56 = vadd.f32 1.0, %v1477_v43  ;;  %vm645_vm7 = vmor %vm643_vm6, %vm644_vm5  ;;  %v656_v4 = vmul.f32 %v591_v57, %v1872_v50  ;;  %v604_v10 = vand.u32 2147483648, %v2035_v17  ;;  %v1441_v43 = vld [vmem:[%s2148_s10] ss:$0 sm:$0xff] }
 0x2c3   :  { %v640_v31 = vsub.f32 1.0, %v639_v29  ;;  %v551_v1 = vmul.f32 %v2027_v14, %v550_v51  ;;  %v541_v9 = vsel %vm2089_vm10, %v1996_v58, %v537_v40  ;;  %v602_v50 = vand.u32 2147483647, %v2035_v17 }
 0x2c4   :  { %v627_v42 = vadd.f32 %v1471_v6, %v626_v32  ;;  %v1479_v60 = vpop.eup %1478  ;;  %1480 = vrcp.f32 %v2072_v56  ;;  %vm543_vm12 = vcmp.eq.f32.partialorder %v542_v62, 8.507059e+37  ;;  %vm554_vm13 = vweird.f32 %v2027_v14 }
 0x2c5   :  { %v641_v45 = vmul.f32 %v1475_v19, %v640_v31  ;;  %v594_v49 = vmul.f32 %v1479_v60, %v2035_v17  ;;  %vm599_vm11 = vweird.f32 %v1479_v60  ;;  %v552_v15 = vadd.f32 %v2027_v14, %v551_v1 }
 0x2c6   :  { %v631_v52 = vsel %vm630_vm4, %v1471_v6, %v627_v42  ;;  %vm598_vm14 = vweird.f32 %v2035_v17  ;;  %vm553_vm15 = vweird.f32 %v1978_v47  ;;  %v605_v20 = vor.u32 1.1754944e-38, %v604_v10 }
 0x2c7   :  { %v636_v48 = vsel %vm2059_vm3, %v635_v44, %v631_v52  ;;  %v642_v59 = vadd.f32 %v1475_v19, %v641_v45  ;;  %v595_v6 = vsub.f32 1.0, %v594_v49  ;;  %vm600_vm0 = vmor %vm598_vm14, %vm599_vm11  ;;  %v557_v22 = vand.u32 2147483647, %v1978_v47 }
 0x2c8   :  { %v659_v54 = vmul.f32 %v636_v48, %v1910_v7  ;;  %vm2105_vm1 = vmor %vm553_vm15, %vm554_vm13  ;;  %vm603_vm2 = vcmp.eq.f32.partialorder %v602_v50, 8.507059e+37  ;;  %v619_v30 = vand.u32 2147483648, %v2072_v56  ;;  %v617_v34 = vand.u32 2147483647, %v2072_v56 }
 0x2c9   :  { %v646_v53 = vsel %vm645_vm7, %v1475_v19, %v642_v59  ;;  %v596_v12 = vmul.f32 %v1479_v60, %v595_v6  ;;  %v559_v19 = vand.u32 2147483648, %v1978_v47  ;;  %v556_v27 = vsel %vm2105_vm1, %v2027_v14, %v552_v15 }
 0x2ca   :  { %v663_v2 = vpack.c.bf16 %v659_v54, %v655_v35  ;;  %v651_v3 = vsel %vm648_vm9, %v650_v61, %v646_v53  ;;  %v1481_v13 = vpop.eup %1480  ;;  %vm558_vm4 = vcmp.eq.f32.partialorder %v557_v22, 8.507059e+37  ;;  %vm613_vm5 = vweird.f32 %v2072_v56 }
 0x2cb   :  { %v660_v5 = vmul.f32 %v651_v3, %v1912_v8  ;;  %v546_v8 = vsel %vm543_vm12, %v545_v26, %v541_v9  ;;  %v597_v16 = vadd.f32 %v1479_v60, %v596_v12  ;;  %v609_v58 = vmul.f32 %v1481_v13, %v2072_v56 }
 0x2cc   :  { %961 = vmatmul.bf16.vlgmr.msra.gmra.mxu0 %v663_v2  ;;  %v653_v17 = vmul.f32 %v546_v8, %v1896_v63  ;;  %vm614_vm3 = vweird.f32 %v1481_v13  ;;  %v560_v36 = vor.u32 1.1754944e-38, %v559_v19  ;;  %v620_v39 = vor.u32 1.1754944e-38, %v619_v30 }
 0x2cd   :  { %v664_v11 = vpack.c.bf16 %v660_v5, %v656_v4  ;;  %v601_v23 = vsel %vm600_vm0, %v1479_v60, %v597_v16  ;;  %v610_v24 = vsub.f32 1.0, %v609_v58  ;;  %vm615_vm6 = vmor %vm613_vm5, %vm614_vm3  ;;  %vm618_vm7 = vcmp.eq.f32.partialorder %v617_v34, 8.507059e+37 }
 0x2ce   :  { %v606_v29 = vsel %vm603_vm2, %v605_v20, %v601_v23  ;;  %v561_v63 = vsel %vm558_vm4, %v560_v36, %v556_v27  ;;  %v1442_v20 = vld [vmem:[%s2149_s11] ss:$0 sm:$0xff]  ;;  %s1513_s11 = smov [#allocation3]  }
 0x2cf   :  { %975 = vmatmul.bf16.vlgmr.msra.gmra.mxu1 %v664_v11  ;;  %v657_v32 = vmul.f32 %v606_v29, %v1946_v25  ;;  %v611_v33 = vmul.f32 %v1481_v13, %v610_v24  ;;  %v654_v42 = vmul.f32 %v561_v63, %v1900_v0  ;;  %v1443_v23 = vld [vmem:[%s2150_s12] ss:$0 sm:$0xff]  ;;  %s1041_s24 = sshll.u32 %s1513_s11, 4  ;;  %s1514_s12 = smov 128   ;;  %s1042_s24 = int_to_ptr.vmem [resolvable:$true] %s1041_s24 }
 0x2d1   :  { %v612_v47 = vadd.f32 %v1481_v13, %v611_v33  ;;  %v661_v31 = vpack.c.bf16 %v657_v32, %v653_v17 }
 0x2d3   :  { %v616_v41 = vsel %vm615_vm6, %v1481_v13, %v612_v47  ;;  %933 = vmatmul.bf16.vlgmr.msrb.gmra.mxu2 %v661_v31 }
 0x2d4   :  { %v621_v14 = vsel %vm618_vm7, %v620_v39, %v616_v41 }
 0x2d5   :  { %v658_v25 = vmul.f32 %v621_v14, %v1993_v55 }
 0x2d7   :  { %v662_v18 = vpack.c.bf16 %v658_v25, %v654_v42 }
 0x2d9   :  { %947 = vmatmul.bf16.vlgmr.msrb.gmra.mxu3 %v662_v18 }
 0x349   :  { %v962_v46 = vpop.f32.mrf.mxu0 }
 0x34c   :  { %v976_v56 = vpop.f32.mrf.mxu1 }
 0x351   :  { %v964_v40 = vpop.f32.mrf.mxu0 }
 0x354   :  { %v978_v61 = vpop.f32.mrf.mxu1 }
 0x356   :  { %v934_v44 = vpop.f32.mrf.mxu2 }
 0x357   :  { %v935_v45 = vadd.f32 %v1441_v43, %v934_v44 }
 0x35c   :  { %v948_v51 = vpop.f32.mrf.mxu3 }
 0x35d   :  { %v949_v52 = vadd.f32 %v948_v51, %v935_v45 }
 0x35e   :  { %v936_v35 = vpop.f32.mrf.mxu2 }
 0x35f   :  { %v963_v57 = vadd.f32 %v962_v46, %v949_v52  ;;  %v937_v48 = vadd.f32 %v1441_v43, %v936_v35 }
 0x361   :  { %v977_v59 = vadd.f32 %v976_v56, %v963_v57 }
 0x363   :  { %v981_v0 = vadd.f32 %v977_v59, %v1839_v37 }
 0x364   :  { %v950_v60 = vpop.f32.mrf.mxu3 }
 0x365   :  { %v951_v55 = vadd.f32 %v950_v60, %v937_v48  ;;  %983 = vadd.xlane.f32.xlu2 %v981_v0 }
 0x367   :  { %v965_v54 = vadd.f32 %v964_v40, %v951_v55 }
 0x369   :  { %v979_v53 = vadd.f32 %v978_v61, %v965_v54 }
 0x36b   :  { %v982_v49 = vadd.f32 %v979_v53, %v1841_v38 }
 0x36d   :  { %985 = vadd.xlane.f32.xlu2 %v982_v49 }
 0x3d8   :  { %v984_v62 = vpop.xlane.xlu2 %983 }
 0x3d9   :  { %v987_v1 = vmul.f32 %v984_v62, %v1625_v28 }
 0x3db   :  { %v989_v2 = vsub.f32 %v981_v0, %v987_v1 }
 0x3dd   :  { %v991_v3 = vmul.f32 %v989_v2, %v989_v2 }
 0x3df   :  { %993 = vadd.xlane.f32.xlu0 %v991_v3 }
 0x3e0   :  { %v986_v4 = vpop.xlane.xlu2 %985 }
 0x3e1   :  { %v988_v7 = vmul.f32 %v986_v4, %v1625_v28 }
 0x3e3   :  { %v990_v37 = vsub.f32 %v982_v49, %v988_v7 }
 0x3e5   :  { %v992_v5 = vmul.f32 %v990_v37, %v990_v37 }
 0x3e7   :  { %995 = vadd.xlane.f32.xlu1 %v992_v5 }
 0x452   :  { %v994_v6 = vpop.xlane.xlu0 %993 }
 0x453   :  { %v997_v9 = vmul.f32 %v994_v6, %v1625_v28 }
 0x455   :  { %v999_v26 = vadd.f32 1e-05, %v997_v9 }
 0x457   :  { %1482 = vrsqrt.f32 %v999_v26  ;;  %vm1007_vm9 = vweird.f32 %v999_v26 }
 0x45a   :  { %v996_v10 = vpop.xlane.xlu1 %995 }
 0x45b   :  { %v998_v38 = vmul.f32 %v996_v10, %v1625_v28 }
 0x45d   :  { %v1483_v11 = vpop.eup %1482  ;;  %v1000_v12 = vadd.f32 1e-05, %v998_v38 }
 0x45e   :  { %v1002_v50 = vmul.f32 %v1483_v11, %v999_v26  ;;  %vm1008_vm8 = vweird.f32 %v1483_v11 }
 0x45f   :  { %1484 = vrsqrt.f32 %v1000_v12  ;;  %vm1009_vm10 = vmor %vm1007_vm9, %vm1008_vm8  ;;  %vm1017_vm12 = vweird.f32 %v1000_v12 }
 0x460   :  { %v1003_v13 = vmul.f32 %v1483_v11, %v1002_v50 }
 0x462   :  { %v1004_v15 = vmul.f32 0.5, %v1003_v13 }
 0x464   :  { %v1005_v8 = vsub.f32 1.5, %v1004_v15 }
 0x465   :  { %v1485_v16 = vpop.eup %1484 }
 0x466   :  { %v1006_v58 = vmul.f32 %v1483_v11, %v1005_v8  ;;  %v1012_v19 = vmul.f32 %v1485_v16, %v1000_v12  ;;  %vm1018_vm11 = vweird.f32 %v1485_v16 }
 0x467   :  { %vm1019_vm13 = vmor %vm1017_vm12, %vm1018_vm11 }
 0x468   :  { %v1010_v21 = vsel %vm1009_vm10, %v1483_v11, %v1006_v58  ;;  %v1013_v22 = vmul.f32 %v1485_v16, %v1012_v19 }
 0x469   :  { %v1021_v28 = vmul.f32 %v1010_v21, %v989_v2 }
 0x46a   :  { %v1014_v24 = vmul.f32 0.5, %v1013_v22 }
 0x46b   :  { %v1027_v17 = vmul.f32 %v1442_v20, %v1021_v28 }
 0x46c   :  { %v1015_v27 = vsub.f32 1.5, %v1014_v24 }
 0x46d   :  { %v1033_v29 = vadd.f32 %v1443_v23, %v1027_v17 }
 0x46e   :  { %v1016_v30 = vmul.f32 %v1485_v16, %v1015_v27 }
 0x46f   :  { %1035 = vst [vmem:[#allocation3] sm:$0xff] %v1033_v29 }
 0x470   :  { %v1020_v32 = vsel %vm1019_vm13, %v1485_v16, %v1016_v30 }
 0x471   :  { %v1022_v33 = vmul.f32 %v1020_v32, %v990_v37 }
 0x473   :  { %v1028_v34 = vmul.f32 %v1442_v20, %v1022_v33 }
 0x475   :  { %v1034_v36 = vadd.f32 %v1443_v23, %v1028_v34 }
 0x477   :  { %1036 = vst [vmem:[#allocation3 + $0x8] sm:$0xff] %v1034_v36 }
 0x478   :  { %1049 = dma.vmem_to_hbm [thread:$0]  %s1042_s24, 256, %s1044_s27, [#allocation4], %s1514_s12, %s1514_s12, %s1515_s7  }
 0x479   :  { %1510 = dma.done.wait [#allocation4], 256  }
 0x47a   :  { %1511 = vsyncadd [#allocation4], 4294967040 }
 0x47b   :  { %1054 = vsyncpa [#allocation4], 1 }

</bundles_post_ra>
